<compile_context>
chip_gen: v6e
topology: v6e:2x2x1
jax: 0.10.0
libtpu: 0.0.40
codegen_flags: <defaults>
</compile_context>

<pallas_src>
import jax
import jax.numpy as jnp
from jax.experimental import pallas as pl
from jax.experimental.pallas import tpu as pltpu


def cnn_lstm_kernel(xcol_ref, wc_ref, bc_ref, wih_ref, whh_ref, bl_ref,
                    wfc_ref, bfc_ref, out_ref, seq_scr):
    """Fused conv1d(same) + relu + maxpool(2) + stacked LSTM + fc.

    xcol_ref: (L*B, K*Cin)   bf16  time-major im2col patches (built in wrapper)
    wc_ref  : (K*Cin, H)     bf16  conv weight, tap-major rows
    bc_ref  : (1, H)         f32   conv bias
    wih_ref : (NL, H, 4*GP)  bf16  LSTM input->hidden, gate-padded columns
    whh_ref : (NL, H, 4*GP)  bf16  LSTM hidden->hidden, gate-padded columns
    bl_ref  : (NL, 1, 4*GP)  f32   combined LSTM bias (b_ih + b_hh), gate-padded
    wfc_ref : (H, O)         bf16  fc weight (transposed)
    bfc_ref : (1, O)         f32   fc bias
    out_ref : (B, O)         f32
    seq_scr : (T, B, H)      bf16  VMEM scratch for per-timestep layer outputs
    """
    B, O = out_ref.shape
    LB = xcol_ref.shape[0]
    L = LB // B
    T = L // 2                       # MaxPool1d(kernel=2, stride=2), floor
    H = wfc_ref.shape[0]
    NL, _, G4 = wih_ref.shape
    GP = G4 // 4                     # per-gate padded width (128-lane aligned)

    # ---- Conv1d('same') as ONE lane-dense matmul (im2col done in wrapper) ---
    y = jnp.dot(xcol_ref[...], wc_ref[...], preferred_element_type=jnp.float32)
    y = jnp.maximum(y + bc_ref[...], 0.0)                      # (L*B, H) f32

    # ---- MaxPool1d(2): single strided max over the leading (time) axis ------
    y = y.reshape(L, B, H)[:2 * T].reshape(T, 2, B, H)
    seq = jnp.maximum(y[:, 0], y[:, 1]).astype(jnp.bfloat16)   # (T, B, H)

    # ---- stacked LSTM (batch_first, zero init), gate order i,f,g,o ----------
    h_last = None
    for l in range(NL):
        if l == 0:
            seq_flat = seq.reshape(T * B, H)
        else:
            seq_flat = seq_scr[...].reshape(T * B, H)          # leading-axis view

        # Hoisted input->hidden projection for ALL timesteps: one big matmul.
        gx = jnp.dot(seq_flat, wih_ref[l], preferred_element_type=jnp.float32)
        gx = (gx + bl_ref[l]).reshape(T, B, G4)                # (T, B, 4*GP) f32

        h = jnp.zeros((B, H), jnp.bfloat16)                    # h stays bf16
        c = jnp.zeros((B, GP), jnp.float32)                    # c stays f32
        for t in range(T):
            # Only the hidden->hidden matmul remains on the serial chain.
            gates = gx[t] + jnp.dot(h, whh_ref[l],
                                    preferred_element_type=jnp.float32)
            # All gate slices are 128-lane aligned (no XLU rotations).
            i_b = jax.nn.sigmoid(gates[:, 0 * GP:1 * GP])
            f_b = jax.nn.sigmoid(gates[:, 1 * GP:2 * GP])
            g_b = jnp.tanh(gates[:, 2 * GP:3 * GP])
            o_b = jax.nn.sigmoid(gates[:, 3 * GP:4 * GP])
            c = f_b * c + i_b * g_b                            # pad lanes stay 0
            h = (o_b * jnp.tanh(c))[:, :H].astype(jnp.bfloat16)
            if l < NL - 1:
                seq_scr[t] = h                                 # leading-axis store
        h_last = h

    # ---- fc on last timestep, single (B, O) store ----------------------------
    res = jnp.dot(h_last, wfc_ref[...],
                  preferred_element_type=jnp.float32) + bfc_ref[...]
    out_ref[...] = res


def cnn_lstm_forward(x, params):
    """x: (B, L, Cin) float32 -> (B, O) float32."""
    B, L, Cin = x.shape
    K, _, H = params["wc"].shape
    O = params["wfc"].shape[1]
    NL = params["wih"].shape[0]
    T = L // 2
    assert T >= 1, "sequence too short for MaxPool1d(2) + LSTM"
    GP = ((H + 127) // 128) * 128          # per-gate width padded to lane tile

    pad_l = (K - 1) // 2
    pad_r = K - 1 - pad_l                  # matches PyTorch 'same' for odd K
    xp = jnp.pad(x, ((0, 0), (pad_l, pad_r), (0, 0)))

    # ---- one-time prep (outside the kernel; plain XLA glue) -----------------
    # Time-major im2col patches so the conv matmul lands directly in (L, B, H).
    xcol = jnp.concatenate([xp[:, k:k + L, :] for k in range(K)], axis=-1)
    xcol = jnp.transpose(xcol, (1, 0, 2)).reshape(L * B, K * Cin)
    xcol = xcol.astype(jnp.bfloat16)

    wc_flat = params["wc"].reshape(K * Cin, H).astype(jnp.bfloat16)

    def pad_gate_cols(w):
        # (..., 4H) -> (..., 4*GP); gate j occupies columns [j*GP, j*GP+H),
        # the rest are zeros (so padded gate lanes compute exactly 0 state).
        parts = []
        for j in range(4):
            blk = w[..., j * H:(j + 1) * H]
            widths = [(0, 0)] * (w.ndim - 1) + [(0, GP - H)]
            parts.append(jnp.pad(blk, widths))
        return jnp.concatenate(parts, axis=-1)

    wih = pad_gate_cols(params["wih"]).astype(jnp.bfloat16)    # (NL, H, 4*GP)
    whh = pad_gate_cols(params["whh"]).astype(jnp.bfloat16)    # (NL, H, 4*GP)
    bl = pad_gate_cols(params["bl"]).astype(jnp.float32)       # (NL, 1, 4*GP)
    wfc = params["wfc"].astype(jnp.bfloat16)

    # Advisory cost estimate for XLA's scheduler.
    flops = (2 * L * B * K * Cin * H                 # conv
             + NL * 2 * T * B * H * 4 * GP           # input->hidden proj
             + NL * T * 2 * B * H * 4 * GP           # hidden->hidden recurrence
             + 2 * B * H * O)                        # fc
    transcendentals = NL * T * 5 * B * GP
    bytes_accessed = (xcol.size * 2 + wc_flat.size * 2 + params["bc"].size * 4
                      + wih.size * 2 + whh.size * 2 + bl.size * 4
                      + wfc.size * 2 + params["bfc"].size * 4 + B * O * 4)

    vmem = pl.BlockSpec(memory_space=pltpu.MemorySpace.VMEM)
    return pl.pallas_call(
        cnn_lstm_kernel,
        out_shape=jax.ShapeDtypeStruct((B, O), jnp.float32),
        in_specs=[vmem] * 8,
        out_specs=vmem,
        scratch_shapes=[pltpu.VMEM((T, B, H), jnp.bfloat16)],
        cost_estimate=pl.CostEstimate(flops=int(flops),
                                      transcendentals=int(transcendentals),
                                      bytes_accessed=int(bytes_accessed)),
    )(xcol, wc_flat, params["bc"], wih, whh, bl, wfc, params["bfc"])


def reference_forward(x, params):
    """Pure-JAX f32 reference mirroring the PyTorch module semantics."""
    K, Cin, H = params["wc"].shape
    B, L, _ = x.shape
    pad_l = (K - 1) // 2
    xp = jnp.pad(x, ((0, 0), (pad_l, K - 1 - pad_l), (0, 0)))
    y = jnp.zeros((B, L, H), jnp.float32)
    for k in range(K):
        y = y + jnp.einsum("blc,ch->blh", xp[:, k:k + L, :], params["wc"][k])
    y = jax.nn.relu(y + params["bc"])
    T = L // 2
    y = jnp.maximum(y[:, 0:2 * T:2, :], y[:, 1:2 * T:2, :])   # MaxPool1d(2)
    seq = y
    NL = params["wih"].shape[0]
    for l in range(NL):
        h = jnp.zeros((B, H), jnp.float32)
        c = jnp.zeros((B, H), jnp.float32)
        outs = []
        for t in range(T):
            gates = seq[:, t, :] @ params["wih"][l] + h @ params["whh"][l] + params["bl"][l]
            i_g = jax.nn.sigmoid(gates[:, 0:H])
            f_g = jax.nn.sigmoid(gates[:, H:2 * H])
            g_g = jnp.tanh(gates[:, 2 * H:3 * H])
            o_g = jax.nn.sigmoid(gates[:, 3 * H:4 * H])
            c = f_g * c + i_g * g_g
            h = o_g * jnp.tanh(c)
            outs.append(h)
        seq = jnp.stack(outs, axis=1)
    return seq[:, -1, :] @ params["wfc"] + params["bfc"]


if __name__ == "__main__":
    # Shapes implied by the module: input_size=6, hidden_size=64, num_layers=2,
    # output_size=forecast_horizon=1, kernel_size=3; small batch=2, seq_len=8.
    B, L, CIN = 2, 8, 6
    H, NL, O, K = 64, 2, 1, 3

    key = jax.random.PRNGKey(0)
    ks = jax.random.split(key, 8)
    params = {
        "wc":  0.1 * jax.random.normal(ks[0], (K, CIN, H), jnp.float32),
        "bc":  0.1 * jax.random.normal(ks[1], (1, H), jnp.float32),
        "wih": 0.1 * jax.random.normal(ks[2], (NL, H, 4 * H), jnp.float32),
        "whh": 0.1 * jax.random.normal(ks[3], (NL, H, 4 * H), jnp.float32),
        "bl":  0.1 * jax.random.normal(ks[4], (NL, 1, 4 * H), jnp.float32),
        "wfc": 0.1 * jax.random.normal(ks[5], (H, O), jnp.float32),
        "bfc": 0.1 * jax.random.normal(ks[6], (1, O), jnp.float32),
    }
    x = jax.random.normal(ks[7], (B, L, CIN), jnp.float32)

    out = jax.block_until_ready(cnn_lstm_forward(x, params))
    ref = jax.block_until_ready(reference_forward(x, params))

    assert out.shape == (B, O), out.shape
    assert jnp.allclose(out, ref, atol=1e-2, rtol=1e-2), (out, ref)

    print("KERNEL_OK")
</pallas_src>

<mosaic_0001>
module attributes {stable_mosaic.version = 11 : i64} {
  func.func @cnn_lstm_kernel(%arg0: memref<16x18xbf16, #tpu.memory_space<vmem>>, %arg1: memref<18x64xbf16, #tpu.memory_space<vmem>>, %arg2: memref<1x64xf32, #tpu.memory_space<vmem>>, %arg3: memref<2x64x512xbf16, #tpu.memory_space<vmem>>, %arg4: memref<2x64x512xbf16, #tpu.memory_space<vmem>>, %arg5: memref<2x1x512xf32, #tpu.memory_space<vmem>>, %arg6: memref<64x1xbf16, #tpu.memory_space<vmem>>, %arg7: memref<1x1xf32, #tpu.memory_space<vmem>>, %arg8: memref<2x1xf32, #tpu.memory_space<vmem>>, %arg9: memref<4x2x64xbf16, #tpu.memory_space<vmem>>) attributes {dimension_semantics = [], scalar_prefetch = 0 : i64, scratch_operands = 1 : i64, tpu.core_type = #tpu.core_type<tc>} {
    %c0 = arith.constant 0 : index
    %c0_0 = arith.constant 0 : index
    %0 = vector.load %arg0[%c0, %c0_0] : memref<16x18xbf16, #tpu.memory_space<vmem>>, vector<16x18xbf16>
    %c0_1 = arith.constant 0 : index
    %c0_2 = arith.constant 0 : index
    %1 = vector.load %arg1[%c0_1, %c0_2] : memref<18x64xbf16, #tpu.memory_space<vmem>>, vector<18x64xbf16>
    %cst = arith.constant dense<0.000000e+00> : vector<16x64xf32>
    %2 = tpu.matmul %0, %1, %cst {dimension_numbers = #tpu.dot_dimension_numbers<[1], [0], [0], [1], [0, 0, 1, 1], [], []>} : vector<16x18xbf16>, vector<18x64xbf16>, vector<16x64xf32> -> vector<16x64xf32>
    %c0_3 = arith.constant 0 : index
    %c0_4 = arith.constant 0 : index
    %3 = vector.load %arg2[%c0_3, %c0_4] : memref<1x64xf32, #tpu.memory_space<vmem>>, vector<1x64xf32>
    %4 = vector.broadcast %3 : vector<1x64xf32> to vector<16x64xf32>
    %5 = arith.addf %2, %4 : vector<16x64xf32>
    %cst_5 = arith.constant 0.000000e+00 : f32
    %6 = vector.broadcast %cst_5 : f32 to vector<16x64xf32>
    %7 = arith.maximumf %5, %6 : vector<16x64xf32>
    %8 = vector.shape_cast %7 : vector<16x64xf32> to vector<8x2x64xf32>
    %9 = vector.shape_cast %8 : vector<8x2x64xf32> to vector<4x2x2x64xf32>
    %10 = vector.extract_strided_slice %9 {offsets = [0, 0, 0, 0], sizes = [4, 1, 2, 64], strides = [1, 1, 1, 1]} : vector<4x2x2x64xf32> to vector<4x1x2x64xf32>
    %11 = vector.shape_cast %10 : vector<4x1x2x64xf32> to vector<4x2x64xf32>
    %12 = vector.extract_strided_slice %9 {offsets = [0, 1, 0, 0], sizes = [4, 1, 2, 64], strides = [1, 1, 1, 1]} : vector<4x2x2x64xf32> to vector<4x1x2x64xf32>
    %13 = vector.shape_cast %12 : vector<4x1x2x64xf32> to vector<4x2x64xf32>
    %14 = arith.maximumf %11, %13 : vector<4x2x64xf32>
    %15 = arith.truncf %14 : vector<4x2x64xf32> to vector<4x2x64xbf16>
    %16 = vector.shape_cast %15 : vector<4x2x64xbf16> to vector<8x64xbf16>
    %c0_6 = arith.constant 0 : index
    %c0_7 = arith.constant 0 : index
    %c0_8 = arith.constant 0 : index
    %17 = vector.load %arg3[%c0_6, %c0_7, %c0_8] : memref<2x64x512xbf16, #tpu.memory_space<vmem>>, vector<1x64x512xbf16>
    %18 = vector.shape_cast %17 : vector<1x64x512xbf16> to vector<64x512xbf16>
    %cst_9 = arith.constant dense<0.000000e+00> : vector<8x512xf32>
    %19 = tpu.matmul %16, %18, %cst_9 {dimension_numbers = #tpu.dot_dimension_numbers<[1], [0], [0], [1], [0, 0, 1, 1], [], []>} : vector<8x64xbf16>, vector<64x512xbf16>, vector<8x512xf32> -> vector<8x512xf32>
    %c0_10 = arith.constant 0 : index
    %c0_11 = arith.constant 0 : index
    %c0_12 = arith.constant 0 : index
    %20 = vector.load %arg5[%c0_10, %c0_11, %c0_12] : memref<2x1x512xf32, #tpu.memory_space<vmem>>, vector<1x1x512xf32>
    %21 = vector.shape_cast %20 : vector<1x1x512xf32> to vector<1x512xf32>
    %22 = vector.broadcast %21 : vector<1x512xf32> to vector<8x512xf32>
    %23 = arith.addf %19, %22 : vector<8x512xf32>
    %24 = vector.shape_cast %23 : vector<8x512xf32> to vector<4x2x512xf32>
    %cst_13 = arith.constant 0.000000e+00 : bf16
    %25 = vector.broadcast %cst_13 : bf16 to vector<2x64xbf16>
    %cst_14 = arith.constant 0.000000e+00 : f32
    %26 = vector.broadcast %cst_14 : f32 to vector<2x128xf32>
    %27 = vector.extract_strided_slice %24 {offsets = [0, 0, 0], sizes = [1, 2, 512], strides = [1, 1, 1]} : vector<4x2x512xf32> to vector<1x2x512xf32>
    %28 = vector.shape_cast %27 : vector<1x2x512xf32> to vector<2x512xf32>
    %c0_15 = arith.constant 0 : index
    %c0_16 = arith.constant 0 : index
    %c0_17 = arith.constant 0 : index
    %29 = vector.load %arg4[%c0_15, %c0_16, %c0_17] : memref<2x64x512xbf16, #tpu.memory_space<vmem>>, vector<1x64x512xbf16>
    %30 = vector.shape_cast %29 : vector<1x64x512xbf16> to vector<64x512xbf16>
    %cst_18 = arith.constant dense<0.000000e+00> : vector<2x512xf32>
    %31 = tpu.matmul %25, %30, %cst_18 {dimension_numbers = #tpu.dot_dimension_numbers<[1], [0], [0], [1], [0, 0, 1, 1], [], []>} : vector<2x64xbf16>, vector<64x512xbf16>, vector<2x512xf32> -> vector<2x512xf32>
    %32 = arith.addf %28, %31 : vector<2x512xf32>
    %33 = vector.extract_strided_slice %32 {offsets = [0, 0], sizes = [2, 128], strides = [1, 1]} : vector<2x512xf32> to vector<2x128xf32>
    %34 = arith.negf %33 : vector<2x128xf32>
    %35 = math.exp %34 : vector<2x128xf32>
    %cst_19 = arith.constant 1.000000e+00 : f32
    %36 = vector.broadcast %cst_19 : f32 to vector<2x128xf32>
    %37 = arith.addf %36, %35 : vector<2x128xf32>
    %38 = arith.divf %36, %37 : vector<2x128xf32>
    %39 = vector.extract_strided_slice %32 {offsets = [0, 128], sizes = [2, 128], strides = [1, 1]} : vector<2x512xf32> to vector<2x128xf32>
    %40 = arith.negf %39 : vector<2x128xf32>
    %41 = math.exp %40 : vector<2x128xf32>
    %cst_20 = arith.constant 1.000000e+00 : f32
    %42 = vector.broadcast %cst_20 : f32 to vector<2x128xf32>
    %43 = arith.addf %42, %41 : vector<2x128xf32>
    %44 = arith.divf %42, %43 : vector<2x128xf32>
    %45 = vector.extract_strided_slice %32 {offsets = [0, 256], sizes = [2, 128], strides = [1, 1]} : vector<2x512xf32> to vector<2x128xf32>
    %46 = math.tanh %45 : vector<2x128xf32>
    %47 = vector.extract_strided_slice %32 {offsets = [0, 384], sizes = [2, 128], strides = [1, 1]} : vector<2x512xf32> to vector<2x128xf32>
    %48 = arith.negf %47 : vector<2x128xf32>
    %49 = math.exp %48 : vector<2x128xf32>
    %cst_21 = arith.constant 1.000000e+00 : f32
    %50 = vector.broadcast %cst_21 : f32 to vector<2x128xf32>
    %51 = arith.addf %50, %49 : vector<2x128xf32>
    %52 = arith.divf %50, %51 : vector<2x128xf32>
    %53 = arith.mulf %44, %26 : vector<2x128xf32>
    %54 = arith.mulf %38, %46 : vector<2x128xf32>
    %55 = arith.addf %53, %54 : vector<2x128xf32>
    %56 = math.tanh %55 : vector<2x128xf32>
    %57 = arith.mulf %52, %56 : vector<2x128xf32>
    %58 = vector.extract_strided_slice %57 {offsets = [0, 0], sizes = [2, 64], strides = [1, 1]} : vector<2x128xf32> to vector<2x64xf32>
    %59 = arith.truncf %58 : vector<2x64xf32> to vector<2x64xbf16>
    %c0_22 = arith.constant 0 : index
    %c0_23 = arith.constant 0 : index
    %c0_24 = arith.constant 0 : index
    %60 = vector.load %arg9[%c0_22, %c0_23, %c0_24] : memref<4x2x64xbf16, #tpu.memory_space<vmem>>, vector<1x2x64xbf16>
    %61 = vector.shape_cast %60 : vector<1x2x64xbf16> to vector<2x64xbf16>
    %62 = vector.shape_cast %59 : vector<2x64xbf16> to vector<1x2x64xbf16>
    tpu.vector_store %arg9[%c0_22, %c0_23, %c0_24], %62 {strides = array<i32>} : memref<4x2x64xbf16, #tpu.memory_space<vmem>>, vector<1x2x64xbf16>,
    %63 = vector.extract_strided_slice %24 {offsets = [1, 0, 0], sizes = [1, 2, 512], strides = [1, 1, 1]} : vector<4x2x512xf32> to vector<1x2x512xf32>
    %64 = vector.shape_cast %63 : vector<1x2x512xf32> to vector<2x512xf32>
    %c0_25 = arith.constant 0 : index
    %c0_26 = arith.constant 0 : index
    %c0_27 = arith.constant 0 : index
    %65 = vector.load %arg4[%c0_25, %c0_26, %c0_27] : memref<2x64x512xbf16, #tpu.memory_space<vmem>>, vector<1x64x512xbf16>
    %66 = vector.shape_cast %65 : vector<1x64x512xbf16> to vector<64x512xbf16>
    %cst_28 = arith.constant dense<0.000000e+00> : vector<2x512xf32>
    %67 = tpu.matmul %59, %66, %cst_28 {dimension_numbers = #tpu.dot_dimension_numbers<[1], [0], [0], [1], [0, 0, 1, 1], [], []>} : vector<2x64xbf16>, vector<64x512xbf16>, vector<2x512xf32> -> vector<2x512xf32>
    %68 = arith.addf %64, %67 : vector<2x512xf32>
    %69 = vector.extract_strided_slice %68 {offsets = [0, 0], sizes = [2, 128], strides = [1, 1]} : vector<2x512xf32> to vector<2x128xf32>
    %70 = arith.negf %69 : vector<2x128xf32>
    %71 = math.exp %70 : vector<2x128xf32>
    %cst_29 = arith.constant 1.000000e+00 : f32
    %72 = vector.broadcast %cst_29 : f32 to vector<2x128xf32>
    %73 = arith.addf %72, %71 : vector<2x128xf32>
    %74 = arith.divf %72, %73 : vector<2x128xf32>
    %75 = vector.extract_strided_slice %68 {offsets = [0, 128], sizes = [2, 128], strides = [1, 1]} : vector<2x512xf32> to vector<2x128xf32>
    %76 = arith.negf %75 : vector<2x128xf32>
    %77 = math.exp %76 : vector<2x128xf32>
    %cst_30 = arith.constant 1.000000e+00 : f32
    %78 = vector.broadcast %cst_30 : f32 to vector<2x128xf32>
    %79 = arith.addf %78, %77 : vector<2x128xf32>
    %80 = arith.divf %78, %79 : vector<2x128xf32>
    %81 = vector.extract_strided_slice %68 {offsets = [0, 256], sizes = [2, 128], strides = [1, 1]} : vector<2x512xf32> to vector<2x128xf32>
    %82 = math.tanh %81 : vector<2x128xf32>
    %83 = vector.extract_strided_slice %68 {offsets = [0, 384], sizes = [2, 128], strides = [1, 1]} : vector<2x512xf32> to vector<2x128xf32>
    %84 = arith.negf %83 : vector<2x128xf32>
    %85 = math.exp %84 : vector<2x128xf32>
    %cst_31 = arith.constant 1.000000e+00 : f32
    %86 = vector.broadcast %cst_31 : f32 to vector<2x128xf32>
    %87 = arith.addf %86, %85 : vector<2x128xf32>
    %88 = arith.divf %86, %87 : vector<2x128xf32>
    %89 = arith.mulf %80, %55 : vector<2x128xf32>
    %90 = arith.mulf %74, %82 : vector<2x128xf32>
    %91 = arith.addf %89, %90 : vector<2x128xf32>
    %92 = math.tanh %91 : vector<2x128xf32>
    %93 = arith.mulf %88, %92 : vector<2x128xf32>
    %94 = vector.extract_strided_slice %93 {offsets = [0, 0], sizes = [2, 64], strides = [1, 1]} : vector<2x128xf32> to vector<2x64xf32>
    %95 = arith.truncf %94 : vector<2x64xf32> to vector<2x64xbf16>
    %c1 = arith.constant 1 : index
    %c0_32 = arith.constant 0 : index
    %c0_33 = arith.constant 0 : index
    %96 = vector.load %arg9[%c1, %c0_32, %c0_33] : memref<4x2x64xbf16, #tpu.memory_space<vmem>>, vector<1x2x64xbf16>
    %97 = vector.shape_cast %96 : vector<1x2x64xbf16> to vector<2x64xbf16>
    %98 = vector.shape_cast %95 : vector<2x64xbf16> to vector<1x2x64xbf16>
    tpu.vector_store %arg9[%c1, %c0_32, %c0_33], %98 {strides = array<i32>} : memref<4x2x64xbf16, #tpu.memory_space<vmem>>, vector<1x2x64xbf16>,
    %99 = vector.extract_strided_slice %24 {offsets = [2, 0, 0], sizes = [1, 2, 512], strides = [1, 1, 1]} : vector<4x2x512xf32> to vector<1x2x512xf32>
    %100 = vector.shape_cast %99 : vector<1x2x512xf32> to vector<2x512xf32>
    %c0_34 = arith.constant 0 : index
    %c0_35 = arith.constant 0 : index
    %c0_36 = arith.constant 0 : index
    %101 = vector.load %arg4[%c0_34, %c0_35, %c0_36] : memref<2x64x512xbf16, #tpu.memory_space<vmem>>, vector<1x64x512xbf16>
    %102 = vector.shape_cast %101 : vector<1x64x512xbf16> to vector<64x512xbf16>
    %cst_37 = arith.constant dense<0.000000e+00> : vector<2x512xf32>
    %103 = tpu.matmul %95, %102, %cst_37 {dimension_numbers = #tpu.dot_dimension_numbers<[1], [0], [0], [1], [0, 0, 1, 1], [], []>} : vector<2x64xbf16>, vector<64x512xbf16>, vector<2x512xf32> -> vector<2x512xf32>
    %104 = arith.addf %100, %103 : vector<2x512xf32>
    %105 = vector.extract_strided_slice %104 {offsets = [0, 0], sizes = [2, 128], strides = [1, 1]} : vector<2x512xf32> to vector<2x128xf32>
    %106 = arith.negf %105 : vector<2x128xf32>
    %107 = math.exp %106 : vector<2x128xf32>
    %cst_38 = arith.constant 1.000000e+00 : f32
    %108 = vector.broadcast %cst_38 : f32 to vector<2x128xf32>
    %109 = arith.addf %108, %107 : vector<2x128xf32>
    %110 = arith.divf %108, %109 : vector<2x128xf32>
    %111 = vector.extract_strided_slice %104 {offsets = [0, 128], sizes = [2, 128], strides = [1, 1]} : vector<2x512xf32> to vector<2x128xf32>
    %112 = arith.negf %111 : vector<2x128xf32>
    %113 = math.exp %112 : vector<2x128xf32>
    %cst_39 = arith.constant 1.000000e+00 : f32
    %114 = vector.broadcast %cst_39 : f32 to vector<2x128xf32>
    %115 = arith.addf %114, %113 : vector<2x128xf32>
    %116 = arith.divf %114, %115 : vector<2x128xf32>
    %117 = vector.extract_strided_slice %104 {offsets = [0, 256], sizes = [2, 128], strides = [1, 1]} : vector<2x512xf32> to vector<2x128xf32>
    %118 = math.tanh %117 : vector<2x128xf32>
    %119 = vector.extract_strided_slice %104 {offsets = [0, 384], sizes = [2, 128], strides = [1, 1]} : vector<2x512xf32> to vector<2x128xf32>
    %120 = arith.negf %119 : vector<2x128xf32>
    %121 = math.exp %120 : vector<2x128xf32>
    %cst_40 = arith.constant 1.000000e+00 : f32
    %122 = vector.broadcast %cst_40 : f32 to vector<2x128xf32>
    %123 = arith.addf %122, %121 : vector<2x128xf32>
    %124 = arith.divf %122, %123 : vector<2x128xf32>
    %125 = arith.mulf %116, %91 : vector<2x128xf32>
    %126 = arith.mulf %110, %118 : vector<2x128xf32>
    %127 = arith.addf %125, %126 : vector<2x128xf32>
    %128 = math.tanh %127 : vector<2x128xf32>
    %129 = arith.mulf %124, %128 : vector<2x128xf32>
    %130 = vector.extract_strided_slice %129 {offsets = [0, 0], sizes = [2, 64], strides = [1, 1]} : vector<2x128xf32> to vector<2x64xf32>
    %131 = arith.truncf %130 : vector<2x64xf32> to vector<2x64xbf16>
    %c2 = arith.constant 2 : index
    %c0_41 = arith.constant 0 : index
    %c0_42 = arith.constant 0 : index
    %132 = vector.load %arg9[%c2, %c0_41, %c0_42] : memref<4x2x64xbf16, #tpu.memory_space<vmem>>, vector<1x2x64xbf16>
    %133 = vector.shape_cast %132 : vector<1x2x64xbf16> to vector<2x64xbf16>
    %134 = vector.shape_cast %131 : vector<2x64xbf16> to vector<1x2x64xbf16>
    tpu.vector_store %arg9[%c2, %c0_41, %c0_42], %134 {strides = array<i32>} : memref<4x2x64xbf16, #tpu.memory_space<vmem>>, vector<1x2x64xbf16>,
    %135 = vector.extract_strided_slice %24 {offsets = [3, 0, 0], sizes = [1, 2, 512], strides = [1, 1, 1]} : vector<4x2x512xf32> to vector<1x2x512xf32>
    %136 = vector.shape_cast %135 : vector<1x2x512xf32> to vector<2x512xf32>
    %c0_43 = arith.constant 0 : index
    %c0_44 = arith.constant 0 : index
    %c0_45 = arith.constant 0 : index
    %137 = vector.load %arg4[%c0_43, %c0_44, %c0_45] : memref<2x64x512xbf16, #tpu.memory_space<vmem>>, vector<1x64x512xbf16>
    %138 = vector.shape_cast %137 : vector<1x64x512xbf16> to vector<64x512xbf16>
    %cst_46 = arith.constant dense<0.000000e+00> : vector<2x512xf32>
    %139 = tpu.matmul %131, %138, %cst_46 {dimension_numbers = #tpu.dot_dimension_numbers<[1], [0], [0], [1], [0, 0, 1, 1], [], []>} : vector<2x64xbf16>, vector<64x512xbf16>, vector<2x512xf32> -> vector<2x512xf32>
    %140 = arith.addf %136, %139 : vector<2x512xf32>
    %141 = vector.extract_strided_slice %140 {offsets = [0, 0], sizes = [2, 128], strides = [1, 1]} : vector<2x512xf32> to vector<2x128xf32>
    %142 = arith.negf %141 : vector<2x128xf32>
    %143 = math.exp %142 : vector<2x128xf32>
    %cst_47 = arith.constant 1.000000e+00 : f32
    %144 = vector.broadcast %cst_47 : f32 to vector<2x128xf32>
    %145 = arith.addf %144, %143 : vector<2x128xf32>
    %146 = arith.divf %144, %145 : vector<2x128xf32>
    %147 = vector.extract_strided_slice %140 {offsets = [0, 128], sizes = [2, 128], strides = [1, 1]} : vector<2x512xf32> to vector<2x128xf32>
    %148 = arith.negf %147 : vector<2x128xf32>
    %149 = math.exp %148 : vector<2x128xf32>
    %cst_48 = arith.constant 1.000000e+00 : f32
    %150 = vector.broadcast %cst_48 : f32 to vector<2x128xf32>
    %151 = arith.addf %150, %149 : vector<2x128xf32>
    %152 = arith.divf %150, %151 : vector<2x128xf32>
    %153 = vector.extract_strided_slice %140 {offsets = [0, 256], sizes = [2, 128], strides = [1, 1]} : vector<2x512xf32> to vector<2x128xf32>
    %154 = math.tanh %153 : vector<2x128xf32>
    %155 = vector.extract_strided_slice %140 {offsets = [0, 384], sizes = [2, 128], strides = [1, 1]} : vector<2x512xf32> to vector<2x128xf32>
    %156 = arith.negf %155 : vector<2x128xf32>
    %157 = math.exp %156 : vector<2x128xf32>
    %cst_49 = arith.constant 1.000000e+00 : f32
    %158 = vector.broadcast %cst_49 : f32 to vector<2x128xf32>
    %159 = arith.addf %158, %157 : vector<2x128xf32>
    %160 = arith.divf %158, %159 : vector<2x128xf32>
    %161 = arith.mulf %152, %127 : vector<2x128xf32>
    %162 = arith.mulf %146, %154 : vector<2x128xf32>
    %163 = arith.addf %161, %162 : vector<2x128xf32>
    %164 = math.tanh %163 : vector<2x128xf32>
    %165 = arith.mulf %160, %164 : vector<2x128xf32>
    %166 = vector.extract_strided_slice %165 {offsets = [0, 0], sizes = [2, 64], strides = [1, 1]} : vector<2x128xf32> to vector<2x64xf32>
    %167 = arith.truncf %166 : vector<2x64xf32> to vector<2x64xbf16>
    %c3 = arith.constant 3 : index
    %c0_50 = arith.constant 0 : index
    %c0_51 = arith.constant 0 : index
    %168 = vector.load %arg9[%c3, %c0_50, %c0_51] : memref<4x2x64xbf16, #tpu.memory_space<vmem>>, vector<1x2x64xbf16>
    %169 = vector.shape_cast %168 : vector<1x2x64xbf16> to vector<2x64xbf16>
    %170 = vector.shape_cast %167 : vector<2x64xbf16> to vector<1x2x64xbf16>
    tpu.vector_store %arg9[%c3, %c0_50, %c0_51], %170 {strides = array<i32>} : memref<4x2x64xbf16, #tpu.memory_space<vmem>>, vector<1x2x64xbf16>,
    %c0_52 = arith.constant 0 : index
    %c0_53 = arith.constant 0 : index
    %c0_54 = arith.constant 0 : index
    %171 = vector.load %arg9[%c0_52, %c0_53, %c0_54] : memref<4x2x64xbf16, #tpu.memory_space<vmem>>, vector<4x2x64xbf16>
    %172 = vector.shape_cast %171 : vector<4x2x64xbf16> to vector<8x64xbf16>
    %c1_55 = arith.constant 1 : index
    %c0_56 = arith.constant 0 : index
    %c0_57 = arith.constant 0 : index
    %173 = vector.load %arg3[%c1_55, %c0_56, %c0_57] : memref<2x64x512xbf16, #tpu.memory_space<vmem>>, vector<1x64x512xbf16>
    %174 = vector.shape_cast %173 : vector<1x64x512xbf16> to vector<64x512xbf16>
    %cst_58 = arith.constant dense<0.000000e+00> : vector<8x512xf32>
    %175 = tpu.matmul %172, %174, %cst_58 {dimension_numbers = #tpu.dot_dimension_numbers<[1], [0], [0], [1], [0, 0, 1, 1], [], []>} : vector<8x64xbf16>, vector<64x512xbf16>, vector<8x512xf32> -> vector<8x512xf32>
    %c1_59 = arith.constant 1 : index
    %c0_60 = arith.constant 0 : index
    %c0_61 = arith.constant 0 : index
    %176 = vector.load %arg5[%c1_59, %c0_60, %c0_61] : memref<2x1x512xf32, #tpu.memory_space<vmem>>, vector<1x1x512xf32>
    %177 = vector.shape_cast %176 : vector<1x1x512xf32> to vector<1x512xf32>
    %178 = vector.broadcast %177 : vector<1x512xf32> to vector<8x512xf32>
    %179 = arith.addf %175, %178 : vector<8x512xf32>
    %180 = vector.shape_cast %179 : vector<8x512xf32> to vector<4x2x512xf32>
    %cst_62 = arith.constant 0.000000e+00 : bf16
    %181 = vector.broadcast %cst_62 : bf16 to vector<2x64xbf16>
    %cst_63 = arith.constant 0.000000e+00 : f32
    %182 = vector.broadcast %cst_63 : f32 to vector<2x128xf32>
    %183 = vector.extract_strided_slice %180 {offsets = [0, 0, 0], sizes = [1, 2, 512], strides = [1, 1, 1]} : vector<4x2x512xf32> to vector<1x2x512xf32>
    %184 = vector.shape_cast %183 : vector<1x2x512xf32> to vector<2x512xf32>
    %c1_64 = arith.constant 1 : index
    %c0_65 = arith.constant 0 : index
    %c0_66 = arith.constant 0 : index
    %185 = vector.load %arg4[%c1_64, %c0_65, %c0_66] : memref<2x64x512xbf16, #tpu.memory_space<vmem>>, vector<1x64x512xbf16>
    %186 = vector.shape_cast %185 : vector<1x64x512xbf16> to vector<64x512xbf16>
    %cst_67 = arith.constant dense<0.000000e+00> : vector<2x512xf32>
    %187 = tpu.matmul %181, %186, %cst_67 {dimension_numbers = #tpu.dot_dimension_numbers<[1], [0], [0], [1], [0, 0, 1, 1], [], []>} : vector<2x64xbf16>, vector<64x512xbf16>, vector<2x512xf32> -> vector<2x512xf32>
    %188 = arith.addf %184, %187 : vector<2x512xf32>
    %189 = vector.extract_strided_slice %188 {offsets = [0, 0], sizes = [2, 128], strides = [1, 1]} : vector<2x512xf32> to vector<2x128xf32>
    %190 = arith.negf %189 : vector<2x128xf32>
    %191 = math.exp %190 : vector<2x128xf32>
    %cst_68 = arith.constant 1.000000e+00 : f32
    %192 = vector.broadcast %cst_68 : f32 to vector<2x128xf32>
    %193 = arith.addf %192, %191 : vector<2x128xf32>
    %194 = arith.divf %192, %193 : vector<2x128xf32>
    %195 = vector.extract_strided_slice %188 {offsets = [0, 128], sizes = [2, 128], strides = [1, 1]} : vector<2x512xf32> to vector<2x128xf32>
    %196 = arith.negf %195 : vector<2x128xf32>
    %197 = math.exp %196 : vector<2x128xf32>
    %cst_69 = arith.constant 1.000000e+00 : f32
    %198 = vector.broadcast %cst_69 : f32 to vector<2x128xf32>
    %199 = arith.addf %198, %197 : vector<2x128xf32>
    %200 = arith.divf %198, %199 : vector<2x128xf32>
    %201 = vector.extract_strided_slice %188 {offsets = [0, 256], sizes = [2, 128], strides = [1, 1]} : vector<2x512xf32> to vector<2x128xf32>
    %202 = math.tanh %201 : vector<2x128xf32>
    %203 = vector.extract_strided_slice %188 {offsets = [0, 384], sizes = [2, 128], strides = [1, 1]} : vector<2x512xf32> to vector<2x128xf32>
    %204 = arith.negf %203 : vector<2x128xf32>
    %205 = math.exp %204 : vector<2x128xf32>
    %cst_70 = arith.constant 1.000000e+00 : f32
    %206 = vector.broadcast %cst_70 : f32 to vector<2x128xf32>
    %207 = arith.addf %206, %205 : vector<2x128xf32>
    %208 = arith.divf %206, %207 : vector<2x128xf32>
    %209 = arith.mulf %200, %182 : vector<2x128xf32>
    %210 = arith.mulf %194, %202 : vector<2x128xf32>
    %211 = arith.addf %209, %210 : vector<2x128xf32>
    %212 = math.tanh %211 : vector<2x128xf32>
    %213 = arith.mulf %208, %212 : vector<2x128xf32>
    %214 = vector.extract_strided_slice %213 {offsets = [0, 0], sizes = [2, 64], strides = [1, 1]} : vector<2x128xf32> to vector<2x64xf32>
    %215 = arith.truncf %214 : vector<2x64xf32> to vector<2x64xbf16>
    %216 = vector.extract_strided_slice %180 {offsets = [1, 0, 0], sizes = [1, 2, 512], strides = [1, 1, 1]} : vector<4x2x512xf32> to vector<1x2x512xf32>
    %217 = vector.shape_cast %216 : vector<1x2x512xf32> to vector<2x512xf32>
    %c1_71 = arith.constant 1 : index
    %c0_72 = arith.constant 0 : index
    %c0_73 = arith.constant 0 : index
    %218 = vector.load %arg4[%c1_71, %c0_72, %c0_73] : memref<2x64x512xbf16, #tpu.memory_space<vmem>>, vector<1x64x512xbf16>
    %219 = vector.shape_cast %218 : vector<1x64x512xbf16> to vector<64x512xbf16>
    %cst_74 = arith.constant dense<0.000000e+00> : vector<2x512xf32>
    %220 = tpu.matmul %215, %219, %cst_74 {dimension_numbers = #tpu.dot_dimension_numbers<[1], [0], [0], [1], [0, 0, 1, 1], [], []>} : vector<2x64xbf16>, vector<64x512xbf16>, vector<2x512xf32> -> vector<2x512xf32>
    %221 = arith.addf %217, %220 : vector<2x512xf32>
    %222 = vector.extract_strided_slice %221 {offsets = [0, 0], sizes = [2, 128], strides = [1, 1]} : vector<2x512xf32> to vector<2x128xf32>
    %223 = arith.negf %222 : vector<2x128xf32>
    %224 = math.exp %223 : vector<2x128xf32>
    %cst_75 = arith.constant 1.000000e+00 : f32
    %225 = vector.broadcast %cst_75 : f32 to vector<2x128xf32>
    %226 = arith.addf %225, %224 : vector<2x128xf32>
    %227 = arith.divf %225, %226 : vector<2x128xf32>
    %228 = vector.extract_strided_slice %221 {offsets = [0, 128], sizes = [2, 128], strides = [1, 1]} : vector<2x512xf32> to vector<2x128xf32>
    %229 = arith.negf %228 : vector<2x128xf32>
    %230 = math.exp %229 : vector<2x128xf32>
    %cst_76 = arith.constant 1.000000e+00 : f32
    %231 = vector.broadcast %cst_76 : f32 to vector<2x128xf32>
    %232 = arith.addf %231, %230 : vector<2x128xf32>
    %233 = arith.divf %231, %232 : vector<2x128xf32>
    %234 = vector.extract_strided_slice %221 {offsets = [0, 256], sizes = [2, 128], strides = [1, 1]} : vector<2x512xf32> to vector<2x128xf32>
    %235 = math.tanh %234 : vector<2x128xf32>
    %236 = vector.extract_strided_slice %221 {offsets = [0, 384], sizes = [2, 128], strides = [1, 1]} : vector<2x512xf32> to vector<2x128xf32>
    %237 = arith.negf %236 : vector<2x128xf32>
    %238 = math.exp %237 : vector<2x128xf32>
    %cst_77 = arith.constant 1.000000e+00 : f32
    %239 = vector.broadcast %cst_77 : f32 to vector<2x128xf32>
    %240 = arith.addf %239, %238 : vector<2x128xf32>
    %241 = arith.divf %239, %240 : vector<2x128xf32>
    %242 = arith.mulf %233, %211 : vector<2x128xf32>
    %243 = arith.mulf %227, %235 : vector<2x128xf32>
    %244 = arith.addf %242, %243 : vector<2x128xf32>
    %245 = math.tanh %244 : vector<2x128xf32>
    %246 = arith.mulf %241, %245 : vector<2x128xf32>
    %247 = vector.extract_strided_slice %246 {offsets = [0, 0], sizes = [2, 64], strides = [1, 1]} : vector<2x128xf32> to vector<2x64xf32>
    %248 = arith.truncf %247 : vector<2x64xf32> to vector<2x64xbf16>
    %249 = vector.extract_strided_slice %180 {offsets = [2, 0, 0], sizes = [1, 2, 512], strides = [1, 1, 1]} : vector<4x2x512xf32> to vector<1x2x512xf32>
    %250 = vector.shape_cast %249 : vector<1x2x512xf32> to vector<2x512xf32>
    %c1_78 = arith.constant 1 : index
    %c0_79 = arith.constant 0 : index
    %c0_80 = arith.constant 0 : index
    %251 = vector.load %arg4[%c1_78, %c0_79, %c0_80] : memref<2x64x512xbf16, #tpu.memory_space<vmem>>, vector<1x64x512xbf16>
    %252 = vector.shape_cast %251 : vector<1x64x512xbf16> to vector<64x512xbf16>
    %cst_81 = arith.constant dense<0.000000e+00> : vector<2x512xf32>
    %253 = tpu.matmul %248, %252, %cst_81 {dimension_numbers = #tpu.dot_dimension_numbers<[1], [0], [0], [1], [0, 0, 1, 1], [], []>} : vector<2x64xbf16>, vector<64x512xbf16>, vector<2x512xf32> -> vector<2x512xf32>
    %254 = arith.addf %250, %253 : vector<2x512xf32>
    %255 = vector.extract_strided_slice %254 {offsets = [0, 0], sizes = [2, 128], strides = [1, 1]} : vector<2x512xf32> to vector<2x128xf32>
    %256 = arith.negf %255 : vector<2x128xf32>
    %257 = math.exp %256 : vector<2x128xf32>
    %cst_82 = arith.constant 1.000000e+00 : f32
    %258 = vector.broadcast %cst_82 : f32 to vector<2x128xf32>
    %259 = arith.addf %258, %257 : vector<2x128xf32>
    %260 = arith.divf %258, %259 : vector<2x128xf32>
    %261 = vector.extract_strided_slice %254 {offsets = [0, 128], sizes = [2, 128], strides = [1, 1]} : vector<2x512xf32> to vector<2x128xf32>
    %262 = arith.negf %261 : vector<2x128xf32>
    %263 = math.exp %262 : vector<2x128xf32>
    %cst_83 = arith.constant 1.000000e+00 : f32
    %264 = vector.broadcast %cst_83 : f32 to vector<2x128xf32>
    %265 = arith.addf %264, %263 : vector<2x128xf32>
    %266 = arith.divf %264, %265 : vector<2x128xf32>
    %267 = vector.extract_strided_slice %254 {offsets = [0, 256], sizes = [2, 128], strides = [1, 1]} : vector<2x512xf32> to vector<2x128xf32>
    %268 = math.tanh %267 : vector<2x128xf32>
    %269 = vector.extract_strided_slice %254 {offsets = [0, 384], sizes = [2, 128], strides = [1, 1]} : vector<2x512xf32> to vector<2x128xf32>
    %270 = arith.negf %269 : vector<2x128xf32>
    %271 = math.exp %270 : vector<2x128xf32>
    %cst_84 = arith.constant 1.000000e+00 : f32
    %272 = vector.broadcast %cst_84 : f32 to vector<2x128xf32>
    %273 = arith.addf %272, %271 : vector<2x128xf32>
    %274 = arith.divf %272, %273 : vector<2x128xf32>
    %275 = arith.mulf %266, %244 : vector<2x128xf32>
    %276 = arith.mulf %260, %268 : vector<2x128xf32>
    %277 = arith.addf %275, %276 : vector<2x128xf32>
    %278 = math.tanh %277 : vector<2x128xf32>
    %279 = arith.mulf %274, %278 : vector<2x128xf32>
    %280 = vector.extract_strided_slice %279 {offsets = [0, 0], sizes = [2, 64], strides = [1, 1]} : vector<2x128xf32> to vector<2x64xf32>
    %281 = arith.truncf %280 : vector<2x64xf32> to vector<2x64xbf16>
    %282 = vector.extract_strided_slice %180 {offsets = [3, 0, 0], sizes = [1, 2, 512], strides = [1, 1, 1]} : vector<4x2x512xf32> to vector<1x2x512xf32>
    %283 = vector.shape_cast %282 : vector<1x2x512xf32> to vector<2x512xf32>
    %c1_85 = arith.constant 1 : index
    %c0_86 = arith.constant 0 : index
    %c0_87 = arith.constant 0 : index
    %284 = vector.load %arg4[%c1_85, %c0_86, %c0_87] : memref<2x64x512xbf16, #tpu.memory_space<vmem>>, vector<1x64x512xbf16>
    %285 = vector.shape_cast %284 : vector<1x64x512xbf16> to vector<64x512xbf16>
    %cst_88 = arith.constant dense<0.000000e+00> : vector<2x512xf32>
    %286 = tpu.matmul %281, %285, %cst_88 {dimension_numbers = #tpu.dot_dimension_numbers<[1], [0], [0], [1], [0, 0, 1, 1], [], []>} : vector<2x64xbf16>, vector<64x512xbf16>, vector<2x512xf32> -> vector<2x512xf32>
    %287 = arith.addf %283, %286 : vector<2x512xf32>
    %288 = vector.extract_strided_slice %287 {offsets = [0, 0], sizes = [2, 128], strides = [1, 1]} : vector<2x512xf32> to vector<2x128xf32>
    %289 = arith.negf %288 : vector<2x128xf32>
    %290 = math.exp %289 : vector<2x128xf32>
    %cst_89 = arith.constant 1.000000e+00 : f32
    %291 = vector.broadcast %cst_89 : f32 to vector<2x128xf32>
    %292 = arith.addf %291, %290 : vector<2x128xf32>
    %293 = arith.divf %291, %292 : vector<2x128xf32>
    %294 = vector.extract_strided_slice %287 {offsets = [0, 128], sizes = [2, 128], strides = [1, 1]} : vector<2x512xf32> to vector<2x128xf32>
    %295 = arith.negf %294 : vector<2x128xf32>
    %296 = math.exp %295 : vector<2x128xf32>
    %cst_90 = arith.constant 1.000000e+00 : f32
    %297 = vector.broadcast %cst_90 : f32 to vector<2x128xf32>
    %298 = arith.addf %297, %296 : vector<2x128xf32>
    %299 = arith.divf %297, %298 : vector<2x128xf32>
    %300 = vector.extract_strided_slice %287 {offsets = [0, 256], sizes = [2, 128], strides = [1, 1]} : vector<2x512xf32> to vector<2x128xf32>
    %301 = math.tanh %300 : vector<2x128xf32>
    %302 = vector.extract_strided_slice %287 {offsets = [0, 384], sizes = [2, 128], strides = [1, 1]} : vector<2x512xf32> to vector<2x128xf32>
    %303 = arith.negf %302 : vector<2x128xf32>
    %304 = math.exp %303 : vector<2x128xf32>
    %cst_91 = arith.constant 1.000000e+00 : f32
    %305 = vector.broadcast %cst_91 : f32 to vector<2x128xf32>
    %306 = arith.addf %305, %304 : vector<2x128xf32>
    %307 = arith.divf %305, %306 : vector<2x128xf32>
    %308 = arith.mulf %299, %277 : vector<2x128xf32>
    %309 = arith.mulf %293, %301 : vector<2x128xf32>
    %310 = arith.addf %308, %309 : vector<2x128xf32>
    %311 = math.tanh %310 : vector<2x128xf32>
    %312 = arith.mulf %307, %311 : vector<2x128xf32>
    %313 = vector.extract_strided_slice %312 {offsets = [0, 0], sizes = [2, 64], strides = [1, 1]} : vector<2x128xf32> to vector<2x64xf32>
    %314 = arith.truncf %313 : vector<2x64xf32> to vector<2x64xbf16>
    %c0_92 = arith.constant 0 : index
    %c0_93 = arith.constant 0 : index
    %315 = vector.load %arg6[%c0_92, %c0_93] : memref<64x1xbf16, #tpu.memory_space<vmem>>, vector<64x1xbf16>
    %cst_94 = arith.constant dense<0.000000e+00> : vector<2x1xf32>
    %316 = tpu.matmul %314, %315, %cst_94 {dimension_numbers = #tpu.dot_dimension_numbers<[1], [0], [0], [1], [0, 0, 1, 1], [], []>} : vector<2x64xbf16>, vector<64x1xbf16>, vector<2x1xf32> -> vector<2x1xf32>
    %c0_95 = arith.constant 0 : index
    %c0_96 = arith.constant 0 : index
    %317 = vector.load %arg7[%c0_95, %c0_96] : memref<1x1xf32, #tpu.memory_space<vmem>>, vector<1x1xf32>
    %318 = vector.broadcast %317 : vector<1x1xf32> to vector<2x1xf32>
    %319 = arith.addf %316, %318 : vector<2x1xf32>
    %c0_97 = arith.constant 0 : index
    %c0_98 = arith.constant 0 : index
    %320 = vector.load %arg8[%c0_97, %c0_98] : memref<2x1xf32, #tpu.memory_space<vmem>>, vector<2x1xf32>
    tpu.vector_store %arg8[%c0_97, %c0_98], %319 {strides = array<i32>} : memref<2x1xf32, #tpu.memory_space<vmem>>, vector<2x1xf32>,
    return
  }
}

</mosaic_0001>

<bundles_post_ra>
// kernel: tpu_custom_call.1
= control target key start
LH: loop header
LB: loop body
LE: loop exit
PB: predicated region body
PF: predicated region fallthrough
CT: control target
= control target key end

     0   :  { %s3387_s0 = inlined_call_operand.vmem [shape: bf16[16,18], index: 0, kind: input, shape index: {}]   ;;  %s3388_s1 = inlined_call_operand.vmem [shape: bf16[18,64], index: 1, kind: input, shape index: {}]   ;;  %s3389_s2 = inlined_call_operand.vmem [shape: f32[1,64], index: 2, kind: input, shape index: {}]   ;;  %s3390_s3 = inlined_call_operand.hbm [shape: bf16[2,64,512], index: 3, kind: input, shape index: {}]   ;;  %s3391_s4 = inlined_call_operand.hbm [shape: bf16[2,64,512], index: 4, kind: input, shape index: {}]   ;;  %s3392_s5 = inlined_call_operand.vmem [shape: f32[2,1,512], index: 5, kind: input, shape index: {}]   ;;  %s3393_s6 = inlined_call_operand.vmem [shape: bf16[64,1], index: 6, kind: input, shape index: {}]   ;;  %s3394_s7 = inlined_call_operand.<no memory space> [shape: f32[1,1], index: 7, kind: input, shape index: {}]   ;;  %s3395_s8 = inlined_call_operand.vmem [shape: f32[2,1], index: 8, kind: output, shape index: {}]  }
   0x1   :  { %v13_v0 = vstv %s3394_s7 }
   0x2   :  { %14 = vst [vmem:[#allocation3] sm:$0x1] %v13_v0 }
   0x3   :  { %15 = vsyncpa [#allocation5], 0 }
   0x4   :  { %16 = vsyncpa [#allocation7], 0  ;;  %s2920_s29 = smov [#allocation4]  }
   0x5   :  { %s28_s30 = sshll.u32 %s2920_s29, 4  ;;  %s29_s30 = int_to_ptr.vmem [resolvable:$true] %s28_s30 }
   0x6   :  { %s2884_s9 = scalar_lea.vmem %s29_s30, 4096  ;;  %p2889_p1 = scmp.lt.s32.totalorder %s29_s30, %s29_s30 }
   0x7   :  { %p2885_p0 = scmp.ne.s32.totalorder %s29_s30, %s2884_s9  ;;  %p2890_p2 = scmp.lt.s32.totalorder %s2884_s9, %s2884_s9 }
   0x9   :  { %p2891_p3 = por %p2890_p2, %p2889_p1 }
   0xb   :  { %p2892_p4 = pnand %p2891_p3, %p2885_p0 }
   0xd   :  { %2895 = shalt.err (!%p2892_p4)
}
   0xe   :  { %s2921_s10 = smov 256   ;;  %s2922_s11 = smov 16  }
   0xf   :  { %34 = dma.hbm_to_vmem [thread:$0]  %s3390_s3, 4096, %s29_s30, [#allocation5], %s2921_s10, %s2921_s10, %s2922_s11  }
  0x10   :  { %s2923_s7 = smov [#allocation6]  }
  0x11   :  { %s40_s14 = sshll.u32 %s2923_s7, 4  ;;  %s41_s14 = int_to_ptr.vmem [resolvable:$true] %s40_s14 }
  0x12   :  { %s2904_s15 = scalar_lea.vmem %s41_s14, 4096  ;;  %p2909_p6 = scmp.lt.s32.totalorder %s41_s14, %s41_s14 }
  0x13   :  { %p2905_p5 = scmp.ne.s32.totalorder %s41_s14, %s2904_s15  ;;  %p2910_p7 = scmp.lt.s32.totalorder %s2904_s15, %s2904_s15 }
  0x15   :  { %p2911_p8 = por %p2910_p7, %p2909_p6 }
  0x17   :  { %p2912_p9 = pnand %p2911_p8, %p2905_p5 }
  0x19   :  { %2915 = shalt.err (!%p2912_p9)
}
  0x1a   :  { %46 = dma.hbm_to_vmem [thread:$0]  %s3391_s4, 4096, %s41_s14, [#allocation7], %s2921_s10, %s2921_s10, %s2922_s11  }
  0x1b   :  { %2916 = dma.done.wait [#allocation5], 4096  }
  0x1c   :  { %2917 = vsyncadd [#allocation5], 4294963200 }
  0x1d   :  { %2918 = dma.done.wait [#allocation7], 4096  }
  0x1e   :  { %2919 = vsyncadd [#allocation7], 4294963200  ;;  %v2924_v1 = vmov 0.0   ;;  %vm2925_vm0 = vmmov 0   ;;  %vm90_vm1 = vcmask 1040384   ;;  %v2646_v4 = vld [vmem:[%s3388_s1] sm:$0xff]   ;;  %v143_v27 = vlaneseq }
  0x1f   :  { %2616 = vmatprep.subr.bf16.mxu0 %v2924_v1  ;;  %2620 = vmatprep.mubr.msk.bf16.mxu0 %vm2925_vm0, %v2924_v1  ;;  %v2645_v2 = vld [vmem:[%s3388_s1 + $0x8] ss:$0 sps:$4 sm:$0x11]   ;;  %v2647_v5 = vld [vmem:[%s3387_s0] sm:$0xff]   ;;  %vm86_vm2 = vcmask 146432   ;;  %v2926_v24 = vmov 0  }
  0x20   :  { %v92_v3 = vsel %vm90_vm1, %v2645_v2, 0  ;;  %v2648_v6 = vld [vmem:[#allocation4 + $0x64] ss:$16 sps:$4 sm:$0xff]   ;;  %v2652_v7 = vld [vmem:[#allocation4 + $0x6c] ss:$16 sps:$4 sm:$0xff]   ;;  %371 = vmatprep.mubr.bf16.mxu1 %v2926_v24  ;;  %v3004_v29 = vshrl.u32 %v143_v27, 7 }
  0x21   :  { %2617 = vmatpush3.bf16.msra.mxu0 %v92_v3  ;;  %v2650_v8 = vld [vmem:[#allocation4 + $0x68] ss:$16 sps:$4 sm:$0xff]   ;;  %v2653_v9 = vld [vmem:[#allocation4 + $0x60] ss:$16 sps:$4 sm:$0xff]   ;;  %347 = vmatprep.subr.bf16.mxu1 %v2648_v6  ;;  %v2654_v10 = vld [vmem:[#allocation4 + $0x44] ss:$16 sps:$4 sm:$0xff]  }
  0x22   :  { %2618 = vmatprep.subr.bf16.mxu0 %v2924_v1  ;;  %348 = vmatpush1.bf16.msra.mxu1 %v2653_v9  ;;  %v2658_v11 = vld [vmem:[#allocation4 + $0x4c] ss:$16 sps:$4 sm:$0xff]   ;;  %v2656_v12 = vld [vmem:[#allocation4 + $0x48] ss:$16 sps:$4 sm:$0xff]   ;;  %v2659_v13 = vld [vmem:[#allocation4 + $0x40] ss:$16 sps:$4 sm:$0xff]  }
  0x23   :  { %349 = vmatprep.subr.bf16.mxu1 %v2654_v10  ;;  %v2660_v14 = vld [vmem:[#allocation4 + $0x24] ss:$16 sps:$4 sm:$0xff]   ;;  %v2664_v15 = vld [vmem:[#allocation4 + $0x2c] ss:$16 sps:$4 sm:$0xff]   ;;  %v2662_v16 = vld [vmem:[#allocation4 + $0x28] ss:$16 sps:$4 sm:$0xff]  }
  0x24   :  { %v2665_v17 = vld [vmem:[#allocation4 + $0x20] ss:$16 sps:$4 sm:$0xff]   ;;  %v2666_v18 = vld [vmem:[#allocation4 + $0x4] ss:$16 sps:$4 sm:$0xff]   ;;  %v2670_v19 = vld [vmem:[#allocation4 + $0xc] ss:$16 sps:$4 sm:$0xff]  }
  0x25   :  { %2619 = vmatpush3.bf16.msra.mxu0 %v2646_v4  ;;  %v2668_v20 = vld [vmem:[#allocation4 + $0x8] ss:$16 sps:$4 sm:$0xff]   ;;  %v2671_v21 = vld [vmem:[#allocation4] ss:$16 sps:$4 sm:$0xff]   ;;  %v2996_v22 = vld [vmem:[#allocation6 + $0x64] ss:$16 sps:$4 sm:$0xff]  }
  0x26   :  { %388 = vmatprep.subr.bf16.mxu0 %v2652_v7  ;;  %350 = vmatpush1.bf16.msra.mxu1 %v2659_v13  ;;  %v2998_v23 = vld [vmem:[#allocation6 + $0x6c] ss:$16 sps:$4 sm:$0xff]   ;;  %v2927_v25 = vmov 1983009808   ;;  %v2442_v30 = vld [vmem:[%s3389_s2] ss:$0 sm:$0xff] }
  0x27   :  { %351 = vmatprep.subr.bf16.mxu1 %v2660_v14  ;;  %v141_v26 = vunpack.c.l.s4 %v2927_v25  ;;  %v2928_v42 = vmov 1966171168   ;;  %v3021_v63 = vld [vmem:[#allocation6 + $0x60] ss:$16 sps:$4 sm:$0xff]   ;;  %v3023_v0 = vld [vmem:[#allocation6 + $0x68] ss:$16 sps:$4 sm:$0xff]  }
  0x28   :  { %2621 = vmatmul.mubr.msk.bf16.vlgmr.msra.gmra.mxu0 %vm86_vm2, %v2647_v5  ;;  %v234_v43 = vunpack.c.l.s4 %v2928_v42  ;;  %vm335_vm3 = vcmask 523264   ;;  %v3026_v3 = vld [vmem:[#allocation6 + $0x44] ss:$16 sps:$4 sm:$0xff]   ;;  %v3028_v4 = vld [vmem:[#allocation6 + $0x4c] ss:$16 sps:$4 sm:$0xff]   ;;  %vm701_vm4 = vcmask 516096  }
  0x29   :  { %389 = vmatpush1.bf16.msra.mxu0 %v2650_v8  ;;  %412 = vmatprep.mubr.bf16.mxu0 %v2926_v24  ;;  %v142_v28 = vunpack.c.0.s8 %v141_v26  ;;  %v3034_v5 = vld [vmem:[#allocation6 + $0x40] ss:$16 sps:$4 sm:$0xff]   ;;  %v3036_v6 = vld [vmem:[#allocation6 + $0x48] ss:$16 sps:$4 sm:$0xff]   ;;  %v3040_v7 = vld [vmem:[#allocation6 + $0x24] ss:$16 sps:$4 sm:$0xff]  }
  0x2a   :  { %390 = vmatprep.subr.bf16.mxu0 %v2658_v11  ;;  %352 = vmatpush1.bf16.msra.mxu1 %v2665_v17  ;;  %v235_v50 = vunpack.c.0.s8 %v234_v43  ;;  %v3042_v8 = vld [vmem:[#allocation6 + $0x2c] ss:$16 sps:$4 sm:$0xff]   ;;  %v3048_v9 = vld [vmem:[#allocation6 + $0x20] ss:$16 sps:$4 sm:$0xff]   ;;  %v3050_v10 = vld [vmem:[#allocation6 + $0x28] ss:$16 sps:$4 sm:$0xff]  }
  0x2b   :  { %353 = vmatprep.subr.bf16.mxu1 %v2666_v18  ;;  %v3010_v33 = vsub.s32 %v142_v28, %v3004_v29  ;;  %v3054_v11 = vld [vmem:[#allocation6 + $0x4] ss:$16 sps:$4 sm:$0xff]   ;;  %v3060_v13 = vld [vmem:[#allocation6] ss:$16 sps:$4 sm:$0xff]   ;;  %v3062_v14 = vld [vmem:[#allocation6 + $0x8] ss:$16 sps:$4 sm:$0xff]  }
  0x2c   :  { %v3017_v56 = vsub.s32 %v235_v50, %v3004_v29  ;;  %v213_v17 = vsub.s32 1, %v3004_v29  ;;  %v221_v18 = vsub.s32 3, %v3004_v29  ;;  %vm2434_vm5 = vcmask 1024  }
  0x2d   :  { %391 = vmatpush1.bf16.msra.mxu0 %v2656_v12  ;;  %v3056_v12 = vld [vmem:[#allocation6 + $0xc] ss:$16 sps:$4 sm:$0xff]  }
  0x2e   :  { %392 = vmatprep.subr.bf16.mxu0 %v2664_v15  ;;  %354 = vmatpush1.bf16.msra.mxu1 %v2671_v21  ;;  %v209_v15 = vsub.s32 0, %v3004_v29 }
  0x2f   :  { %572 = vmatprep.subr.bf16.mxu1 %v2996_v22 }
  0x31   :  { %393 = vmatpush1.bf16.msra.mxu0 %v2662_v16  ;;  %v217_v16 = vsub.s32 2, %v3004_v29 }
  0x32   :  { %394 = vmatprep.subr.bf16.mxu0 %v2670_v19  ;;  %v205_v19 = vld [vmem:[%s3392_s5] sm:$0xf] }
  0x33   :  { %v218_v21 = vrot.slane %v205_v19, %v217_v16  ;;  %v214_v25 = vrot.slane %v205_v19, %v213_v17  ;;  %v222_v26 = vrot.slane %v205_v19, %v221_v18 }
  0x35   :  { %395 = vmatpush1.bf16.msra.mxu0 %v2668_v20  ;;  %v210_v20 = vrot.slane %v205_v19, %v209_v15 }
  0x36   :  { %613 = vmatprep.subr.bf16.mxu0 %v2998_v23 }
  0xe8   :  { %v128_v31 = vpop.f32.mrf.mxu0 }
  0xe9   :  { %v129_v32 = vadd.f32 %v2442_v30, %v128_v31 }
  0xea   :  { %v2622_v34 = vpop.f32.mrf.mxu0 }
  0xeb   :  { %v135_v35 = vmax.f32 %v129_v32, 0.0 }
  0xec   :  { %v131_v36 = vpop.f32.mrf.mxu0 }
  0xed   :  { %v139_v37 = vcombine.high %v135_v35, %v135_v35  ;;  %v146_v38 = vrot.slane %v135_v35, %v3010_v33  ;;  %v132_v39 = vadd.f32 %v2442_v30, %v131_v36 }
  0xee   :  { %v2623_v40 = vpop.f32.mrf.mxu0 }
  0xef   :  { %v153_v41 = vrot.slane %v139_v37, %v3010_v33  ;;  %v136_v44 = vmax.f32 %v132_v39, 0.0  ;;  %v154_v45 = vcombine.high %v146_v38, %v146_v38 }
  0xf1   :  { %v155_v46 = vcombine.high %v153_v41, %v153_v41  ;;  %v156_v47 = vcombine.high %v136_v44, %v136_v44  ;;  %v163_v48 = vrot.slane %v136_v44, %v3010_v33  ;;  %v181_v53 = vmax.f32 %v146_v38, %v154_v45 }
  0xf3   :  { %v182_v49 = vmax.f32 %v153_v41, %v155_v46  ;;  %v170_v51 = vrot.slane %v156_v47, %v3010_v33  ;;  %v171_v52 = vcombine.high %v163_v48, %v163_v48 }
  0xf5   :  { %v172_v54 = vcombine.high %v170_v51, %v170_v51  ;;  %v2447_v55 = vpack.c.bf16 %v182_v49, %v181_v53  ;;  %v183_v57 = vmax.f32 %v163_v48, %v171_v52 }
  0xf7   :  { %v184_v58 = vmax.f32 %v170_v51, %v172_v54  ;;  %v239_v60 = vrot.slane %v2447_v55, %v3017_v56 }
  0xf9   :  { %v2448_v59 = vpack.c.bf16 %v184_v58, %v183_v57 }
  0xfb   :  { %v246_v61 = vrot.slane %v2448_v59, %v3017_v56 }
  0xfd   :  { %v247_v62 = vcombine.low %v239_v60, %v246_v61 }
  0xff   :  { %v254_v2 = vrot.slane %v247_v62, %v3017_v56 }
 0x101   :  { %2465 = vmatmul.mubr.msk.bf16.vlgmr.msra.gmra.mxu1 %vm335_vm3, %v254_v2  ;;  %2466 = vmatmul.mubr.msk.bf16.vlgmr.msra.gmra.mxu0 %vm335_vm3, %v254_v2 }
 0x102   :  { %573 = vmatpush1.bf16.msra.mxu1 %v3021_v63  ;;  %614 = vmatpush1.bf16.msra.mxu0 %v3023_v0 }
 0x103   :  { %574 = vmatprep.subr.bf16.mxu1 %v3026_v3  ;;  %615 = vmatprep.subr.bf16.mxu0 %v3028_v4 }
 0x104   :  { %596 = vmatprep.mubr.bf16.mxu1 %v2926_v24  ;;  %637 = vmatprep.mubr.bf16.mxu0 %v2926_v24 }
 0x106   :  { %575 = vmatpush1.bf16.msra.mxu1 %v3034_v5  ;;  %616 = vmatpush1.bf16.msra.mxu0 %v3036_v6 }
 0x107   :  { %576 = vmatprep.subr.bf16.mxu1 %v3040_v7  ;;  %617 = vmatprep.subr.bf16.mxu0 %v3042_v8 }
 0x10a   :  { %577 = vmatpush1.bf16.msra.mxu1 %v3048_v9  ;;  %618 = vmatpush1.bf16.msra.mxu0 %v3050_v10 }
 0x10b   :  { %578 = vmatprep.subr.bf16.mxu1 %v3054_v11  ;;  %619 = vmatprep.subr.bf16.mxu0 %v3056_v12 }
 0x10e   :  { %579 = vmatpush1.bf16.msra.mxu1 %v3060_v13  ;;  %620 = vmatpush1.bf16.msra.mxu0 %v3062_v14 }
 0x10f   :  { %810 = vmatprep.subr.bf16.mxu1 %v2996_v22  ;;  %851 = vmatprep.subr.bf16.mxu0 %v2998_v23 }
 0x111   :  { %597 = vmatmul.mubr.bf16.vlgmr.msra.gmra.mxu1 %v2926_v24  ;;  %638 = vmatmul.mubr.bf16.vlgmr.msra.gmra.mxu0 %v2926_v24 }
 0x112   :  { %811 = vmatpush1.bf16.msra.mxu1 %v3021_v63  ;;  %852 = vmatpush1.bf16.msra.mxu0 %v3023_v0 }
 0x113   :  { %812 = vmatprep.subr.bf16.mxu1 %v3026_v3  ;;  %853 = vmatprep.subr.bf16.mxu0 %v3028_v4 }
 0x114   :  { %834 = vmatprep.mubr.bf16.mxu1 %v2926_v24  ;;  %875 = vmatprep.mubr.bf16.mxu0 %v2926_v24 }
 0x116   :  { %813 = vmatpush1.bf16.msra.mxu1 %v3034_v5  ;;  %854 = vmatpush1.bf16.msra.mxu0 %v3036_v6 }
 0x117   :  { %814 = vmatprep.subr.bf16.mxu1 %v3040_v7  ;;  %855 = vmatprep.subr.bf16.mxu0 %v3042_v8 }
 0x11a   :  { %815 = vmatpush1.bf16.msra.mxu1 %v3048_v9  ;;  %856 = vmatpush1.bf16.msra.mxu0 %v3050_v10 }
 0x11b   :  { %816 = vmatprep.subr.bf16.mxu1 %v3054_v11  ;;  %857 = vmatprep.subr.bf16.mxu0 %v3056_v12 }
 0x11e   :  { %817 = vmatpush1.bf16.msra.mxu1 %v3060_v13  ;;  %858 = vmatpush1.bf16.msra.mxu0 %v3062_v14 }
 0x11f   :  { %1048 = vmatprep.subr.bf16.mxu1 %v2996_v22  ;;  %1089 = vmatprep.subr.bf16.mxu0 %v2998_v23 }
 0x1c1   :  { %v373_v27 = vpop.f32.mrf.mxu1  ;;  %v414_v28 = vpop.f32.mrf.mxu0 }
 0x1c2   :  { %v374_v32 = vadd.f32 %v373_v27, %v210_v20  ;;  %v415_v34 = vadd.f32 %v414_v28, %v218_v21 }
 0x1c3   :  { %v375_v30 = vpop.f32.mrf.mxu1  ;;  %v416_v31 = vpop.f32.mrf.mxu0 }
 0x1c4   :  { %v376_v35 = vadd.f32 %v375_v30, %v214_v25  ;;  %v417_v36 = vadd.f32 %v416_v31, %v222_v26 }
 0x1c5   :  { %v377_v37 = vpop.f32.mrf.mxu1  ;;  %v418_v38 = vpop.f32.mrf.mxu0 }
 0x1c6   :  { %v425_v39 = vcombine.low %v374_v32, %v376_v35  ;;  %v426_v40 = vcombine.high %v374_v32, %v376_v35  ;;  %v427_v41 = vcombine.low %v415_v34, %v417_v36  ;;  %v428_v42 = vcombine.high %v415_v34, %v417_v36 }
 0x1c7   :  { %v378_v43 = vpop.f32.mrf.mxu1  ;;  %v419_v44 = vpop.f32.mrf.mxu0 }
 0x1c8   :  { %v3106_v45 = vrot.slane %v425_v39, %v3010_v33  ;;  %v3109_v46 = vrot.slane %v426_v40, %v3010_v33  ;;  %v3112_v47 = vrot.slane %v427_v41, %v3010_v33  ;;  %v3115_v48 = vrot.slane %v428_v42, %v3010_v33 }
 0x1ca   :  { %v458_v49 = vcombine.high %v3106_v45, %v3112_v47  ;;  %v459_v50 = vcombine.low %v3109_v46, %v3115_v48  ;;  %v460_v51 = vcombine.high %v3109_v46, %v3115_v48  ;;  %v457_v20 = vcombine.low %v3106_v45, %v3112_v47 }
 0x1d1   :  { %v598_v52 = vpop.f32.mrf.mxu1  ;;  %v639_v53 = vpop.f32.mrf.mxu0 }
 0x1d3   :  { %v600_v54 = vpop.f32.mrf.mxu1  ;;  %v641_v55 = vpop.f32.mrf.mxu0 }
 0x1d4   :  { %v650_v57 = vcombine.low %v598_v52, %v600_v54  ;;  %v651_v58 = vcombine.low %v639_v53, %v641_v55 }
 0x1d5   :  { %v602_v59 = vpop.f32.mrf.mxu1  ;;  %v643_v60 = vpop.f32.mrf.mxu0 }
 0x1d6   :  { %v658_v61 = vrot.slane %v650_v57, %v3010_v33  ;;  %v665_v62 = vrot.slane %v651_v58, %v3010_v33 }
 0x1d7   :  { %v603_v2 = vpop.f32.mrf.mxu1  ;;  %v644_v19 = vpop.f32.mrf.mxu0 }
 0x1d8   :  { %v666_v21 = vcombine.low %v658_v61, %v665_v62 }
 0x1da   :  { %v668_v25 = vadd.f32 %v666_v21, %v457_v20 }
 0x1dc   :  { %v2483_v26 = vmul.f32 -1.442695, %v668_v25  ;;  %v676_v27 = vrot.slane %v668_v25, 2  ;;  %v687_v30 = vrot.slane %v668_v25, 6  ;;  %v684_v34 = vrot.slane %v668_v25, 4 }
 0x1de   :  { %2748 = vpow2.f32 %v2483_v26  ;;  %v2484_v28 = vmul.f32 -1.442695, %v676_v27  ;;  %v2485_v31 = vmul.f32 -1.442695, %v687_v30 }
 0x1e0   :  { %2750 = vpow2.f32 %v2484_v28 }
 0x1e1   :  { %2752 = vpow2.f32 %v2485_v31 }
 0x1eb   :  { %v2749_v32 = vpop.eup %2748 }
 0x1ec   :  { %v672_v35 = vadd.f32 1.0, %v2749_v32 }
 0x1ed   :  { %v2751_v36 = vpop.eup %2750 }
 0x1ee   :  { %2754 = vrcp.f32 %v672_v35  ;;  %v681_v37 = vadd.f32 1.0, %v2751_v36  ;;  %v2753_v38 = vpop.eup %2752 }
 0x1ef   :  { %2756 = vtanh.f32 %v684_v34  ;;  %v692_v42 = vadd.f32 1.0, %v2753_v38 }
 0x1f0   :  { %2758 = vrcp.f32 %v681_v37 }
 0x1f1   :  { %2760 = vrcp.f32 %v692_v42 }
 0x1fb   :  { %v2755_v39 = vpop.eup %2754 }
 0x1fc   :  { %v2757_v40 = vpop.eup %2756 }
 0x1fd   :  { %v2759_v41 = vpop.eup %2758  ;;  %v696_v44 = vmul.f32 %v2757_v40, %v2755_v39 }
 0x1fe   :  { %v695_v43 = vmul.f32 0.0, %v2759_v41  ;;  %v2761_v53 = vpop.eup %2760 }
 0x200   :  { %v3127_v52 = vadd.f32 %v696_v44, %v695_v43 }
 0x202   :  { %2762 = vtanh.f32 %v3127_v52 }
 0x20f   :  { %v2763_v54 = vpop.eup %2762 }
 0x210   :  { %v699_v55 = vmul.f32 %v2763_v54, %v2761_v53 }
 0x212   :  { %v700_v57 = vpack.c.bf16 %v699_v55, %v699_v55 }
 0x214   :  { %702 = vst.msk [vmem:[#allocation2] sm:$0x1] %vm701_vm4, %v700_v57  ;;  %2502 = vmatmul.mubr.msk.bf16.vlgmr.msra.gmra.mxu1 %vm335_vm3, %v700_v57  ;;  %2503 = vmatmul.mubr.msk.bf16.vlgmr.msra.gmra.mxu0 %vm335_vm3, %v700_v57 }
 0x215   :  { %1049 = vmatpush1.bf16.msra.mxu1 %v3021_v63  ;;  %1090 = vmatpush1.bf16.msra.mxu0 %v3023_v0 }
 0x216   :  { %1050 = vmatprep.subr.bf16.mxu1 %v3026_v3  ;;  %1091 = vmatprep.subr.bf16.mxu0 %v3028_v4 }
 0x217   :  { %1072 = vmatprep.mubr.bf16.mxu1 %v2926_v24  ;;  %1113 = vmatprep.mubr.bf16.mxu0 %v2926_v24 }
 0x219   :  { %1051 = vmatpush1.bf16.msra.mxu1 %v3034_v5  ;;  %1092 = vmatpush1.bf16.msra.mxu0 %v3036_v6 }
 0x21a   :  { %1052 = vmatprep.subr.bf16.mxu1 %v3040_v7  ;;  %1093 = vmatprep.subr.bf16.mxu0 %v3042_v8 }
 0x21d   :  { %1053 = vmatpush1.bf16.msra.mxu1 %v3048_v9  ;;  %1094 = vmatpush1.bf16.msra.mxu0 %v3050_v10 }
 0x21e   :  { %1054 = vmatprep.subr.bf16.mxu1 %v3054_v11  ;;  %1095 = vmatprep.subr.bf16.mxu0 %v3056_v12 }
 0x221   :  { %1055 = vmatpush1.bf16.msra.mxu1 %v3060_v13  ;;  %1096 = vmatpush1.bf16.msra.mxu0 %v3062_v14 }
 0x222   :  { %1286 = vmatprep.subr.bf16.mxu1 %v2996_v22  ;;  %1327 = vmatprep.subr.bf16.mxu0 %v2998_v23 }
 0x2d4   :  { %v836_v58 = vpop.f32.mrf.mxu1  ;;  %v877_v59 = vpop.f32.mrf.mxu0 }
 0x2d6   :  { %v838_v60 = vpop.f32.mrf.mxu1  ;;  %v879_v61 = vpop.f32.mrf.mxu0 }
 0x2d7   :  { %v888_v62 = vcombine.low %v836_v58, %v838_v60  ;;  %v889_v2 = vcombine.low %v877_v59, %v879_v61 }
 0x2d8   :  { %v840_v19 = vpop.f32.mrf.mxu1  ;;  %v881_v20 = vpop.f32.mrf.mxu0 }
 0x2d9   :  { %v896_v21 = vrot.slane %v888_v62, %v3010_v33  ;;  %v903_v25 = vrot.slane %v889_v2, %v3010_v33 }
 0x2da   :  { %v841_v26 = vpop.f32.mrf.mxu1  ;;  %v882_v27 = vpop.f32.mrf.mxu0 }
 0x2db   :  { %v904_v28 = vcombine.low %v896_v21, %v903_v25 }
 0x2dd   :  { %v906_v22 = vadd.f32 %v904_v28, %v458_v49 }
 0x2df   :  { %v2504_v23 = vmul.f32 -1.442695, %v906_v22  ;;  %v914_v30 = vrot.slane %v906_v22, 2  ;;  %v925_v32 = vrot.slane %v906_v22, 6  ;;  %v922_v36 = vrot.slane %v906_v22, 4 }
 0x2e1   :  { %2764 = vpow2.f32 %v2504_v23  ;;  %v2505_v31 = vmul.f32 -1.442695, %v914_v30  ;;  %v2506_v34 = vmul.f32 -1.442695, %v925_v32 }
 0x2e3   :  { %2766 = vpow2.f32 %v2505_v31 }
 0x2e4   :  { %2768 = vpow2.f32 %v2506_v34 }
 0x2ee   :  { %v2765_v35 = vpop.eup %2764 }
 0x2ef   :  { %v910_v37 = vadd.f32 1.0, %v2765_v35 }
 0x2f0   :  { %v2767_v38 = vpop.eup %2766 }
 0x2f1   :  { %2770 = vrcp.f32 %v910_v37  ;;  %v919_v39 = vadd.f32 1.0, %v2767_v38  ;;  %v2769_v40 = vpop.eup %2768  ;;  %v2701_v37 = vld [vmem:[#allocation4 + $0xec] ss:$16 sps:$4 sm:$0xff]   ;;  %v2696_v38 = vld [vmem:[#allocation4 + $0xe0] ss:$16 sps:$4 sm:$0xff]  }
 0x2f2   :  { %2772 = vtanh.f32 %v922_v36  ;;  %v930_v49 = vadd.f32 1.0, %v2769_v40  ;;  %v2698_v36 = vld [vmem:[#allocation4 + $0xe4] ss:$16 sps:$4 sm:$0xff]  }
 0x2f3   :  { %2774 = vrcp.f32 %v919_v39  ;;  %v2699_v39 = vld [vmem:[#allocation4 + $0xe8] ss:$16 sps:$4 sm:$0xff]   ;;  %v2704_v40 = vld [vmem:[#allocation4 + $0xc4] ss:$16 sps:$4 sm:$0xff]  }
 0x2f4   :  { %2776 = vrcp.f32 %v930_v49  ;;  %v2710_v49 = vld [vmem:[#allocation4 + $0xa4] ss:$16 sps:$4 sm:$0xff]  }
 0x2fe   :  { %v2771_v41 = vpop.eup %2770 }
 0x2ff   :  { %v2773_v45 = vpop.eup %2772 }
 0x300   :  { %v2775_v47 = vpop.eup %2774  ;;  %v934_v42 = vmul.f32 %v2773_v45, %v2771_v41  ;;  %v2702_v41 = vld [vmem:[#allocation4 + $0xc0] ss:$16 sps:$4 sm:$0xff]   ;;  %v2705_v45 = vld [vmem:[#allocation4 + $0xc8] ss:$16 sps:$4 sm:$0xff]  }
 0x301   :  { %v933_v43 = vmul.f32 %v2775_v47, %v3127_v52  ;;  %v2777_v53 = vpop.eup %2776  ;;  %v2707_v47 = vld [vmem:[#allocation4 + $0xcc] ss:$16 sps:$4 sm:$0xff]  }
 0x303   :  { %v935_v44 = vadd.f32 %v934_v42, %v933_v43  ;;  %v2713_v42 = vld [vmem:[#allocation4 + $0xac] ss:$16 sps:$4 sm:$0xff]   ;;  %v2708_v43 = vld [vmem:[#allocation4 + $0xa0] ss:$16 sps:$4 sm:$0xff]  }
 0x305   :  { %2778 = vtanh.f32 %v935_v44 }
 0x312   :  { %v2779_v54 = vpop.eup %2778 }
 0x313   :  { %v937_v55 = vmul.f32 %v2779_v54, %v2777_v53  ;;  %v2716_v53 = vld [vmem:[#allocation4 + $0x84] ss:$16 sps:$4 sm:$0xff]   ;;  %v2719_v54 = vld [vmem:[#allocation4 + $0x8c] ss:$16 sps:$4 sm:$0xff]  }
 0x315   :  { %v938_v57 = vpack.c.bf16 %v937_v55, %v937_v55  ;;  %v2714_v55 = vld [vmem:[#allocation4 + $0x80] ss:$16 sps:$4 sm:$0xff]  }
 0x317   :  { %940 = vst.msk [vmem:[#allocation2 + $0x1] sm:$0x1] %vm701_vm4, %v938_v57  ;;  %2523 = vmatmul.mubr.msk.bf16.vlgmr.msra.gmra.mxu1 %vm335_vm3, %v938_v57  ;;  %2524 = vmatmul.mubr.msk.bf16.vlgmr.msra.gmra.mxu0 %vm335_vm3, %v938_v57  ;;  %v2717_v57 = vld [vmem:[#allocation4 + $0x88] ss:$16 sps:$4 sm:$0xff]  }
 0x318   :  { %1287 = vmatpush1.bf16.msra.mxu1 %v3021_v63  ;;  %1328 = vmatpush1.bf16.msra.mxu0 %v3023_v0 }
 0x319   :  { %1288 = vmatprep.subr.bf16.mxu1 %v3026_v3  ;;  %1329 = vmatprep.subr.bf16.mxu0 %v3028_v4 }
 0x31a   :  { %1310 = vmatprep.mubr.bf16.mxu1 %v2926_v24  ;;  %1351 = vmatprep.mubr.bf16.mxu0 %v2926_v24 }
 0x31c   :  { %1289 = vmatpush1.bf16.msra.mxu1 %v3034_v5  ;;  %1330 = vmatpush1.bf16.msra.mxu0 %v3036_v6 }
 0x31d   :  { %1290 = vmatprep.subr.bf16.mxu1 %v3040_v7  ;;  %1331 = vmatprep.subr.bf16.mxu0 %v3042_v8 }
 0x320   :  { %1291 = vmatpush1.bf16.msra.mxu1 %v3048_v9  ;;  %1332 = vmatpush1.bf16.msra.mxu0 %v3050_v10 }
 0x321   :  { %1292 = vmatprep.subr.bf16.mxu1 %v3054_v11  ;;  %1333 = vmatprep.subr.bf16.mxu0 %v3056_v12 }
 0x324   :  { %1293 = vmatpush1.bf16.msra.mxu1 %v3060_v13  ;;  %1334 = vmatpush1.bf16.msra.mxu0 %v3062_v14 }
 0x325   :  { %1580 = vmatprep.subr.bf16.mxu1 %v2698_v36  ;;  %1621 = vmatprep.subr.bf16.mxu0 %v2701_v37  ;;  %v1418_v36 = vld [vmem:[#allocation2 + $0x1] sm:$0x1]  ;;  %v1417_v37 = vld [vmem:[#allocation2] sm:$0x1] }
 0x3d7   :  { %v1074_v63 = vpop.f32.mrf.mxu1  ;;  %v1115_v0 = vpop.f32.mrf.mxu0 }
 0x3d9   :  { %v1076_v3 = vpop.f32.mrf.mxu1  ;;  %v1117_v4 = vpop.f32.mrf.mxu0 }
 0x3da   :  { %v1126_v5 = vcombine.low %v1074_v63, %v1076_v3  ;;  %v1127_v6 = vcombine.low %v1115_v0, %v1117_v4  ;;  %v3189_v63 = vld [vmem:[#allocation6 + $0xe4] ss:$16 sps:$4 sm:$0xff]   ;;  %v3191_v0 = vld [vmem:[#allocation6 + $0xec] ss:$16 sps:$4 sm:$0xff]  }
 0x3db   :  { %v1078_v7 = vpop.f32.mrf.mxu1  ;;  %v1119_v8 = vpop.f32.mrf.mxu0 }
 0x3dc   :  { %v1134_v9 = vrot.slane %v1126_v5, %v3010_v33  ;;  %v1141_v10 = vrot.slane %v1127_v6, %v3010_v33 }
 0x3dd   :  { %v1079_v52 = vpop.f32.mrf.mxu1  ;;  %v1120_v11 = vpop.f32.mrf.mxu0 }
 0x3de   :  { %v1142_v58 = vcombine.low %v1134_v9, %v1141_v10 }
 0x3e0   :  { %v1144_v12 = vadd.f32 %v1142_v58, %v459_v50 }
 0x3e2   :  { %v2525_v13 = vmul.f32 -1.442695, %v1144_v12  ;;  %v1152_v14 = vrot.slane %v1144_v12, 2  ;;  %v1163_v60 = vrot.slane %v1144_v12, 6  ;;  %v1160_v2 = vrot.slane %v1144_v12, 4 }
 0x3e4   :  { %2780 = vpow2.f32 %v2525_v13  ;;  %v2526_v59 = vmul.f32 -1.442695, %v1152_v14  ;;  %v2527_v61 = vmul.f32 -1.442695, %v1163_v60 }
 0x3e6   :  { %2782 = vpow2.f32 %v2526_v59 }
 0x3e7   :  { %2784 = vpow2.f32 %v2527_v61 }
 0x3f1   :  { %v2781_v62 = vpop.eup %2780 }
 0x3f2   :  { %v1148_v19 = vadd.f32 1.0, %v2781_v62 }
 0x3f3   :  { %v2783_v20 = vpop.eup %2782 }
 0x3f4   :  { %2786 = vrcp.f32 %v1148_v19  ;;  %v1157_v21 = vadd.f32 1.0, %v2783_v20  ;;  %v2785_v25 = vpop.eup %2784 }
 0x3f5   :  { %2788 = vtanh.f32 %v1160_v2  ;;  %v1168_v28 = vadd.f32 1.0, %v2785_v25 }
 0x3f6   :  { %2790 = vrcp.f32 %v1157_v21 }
 0x3f7   :  { %2792 = vrcp.f32 %v1168_v28 }
 0x401   :  { %v2787_v26 = vpop.eup %2786 }
 0x402   :  { %v2789_v27 = vpop.eup %2788 }
 0x403   :  { %v2791_v50 = vpop.eup %2790  ;;  %v1172_v22 = vmul.f32 %v2789_v27, %v2787_v26 }
 0x404   :  { %v1171_v23 = vmul.f32 %v2791_v50, %v935_v44  ;;  %v2793_v31 = vpop.eup %2792  ;;  %v2711_v44 = vld [vmem:[#allocation4 + $0xa8] ss:$16 sps:$4 sm:$0xff]  }
 0x406   :  { %v3181_v30 = vadd.f32 %v1172_v22, %v1171_v23 }
 0x408   :  { %2794 = vtanh.f32 %v3181_v30 }
 0x415   :  { %v2795_v32 = vpop.eup %2794 }
 0x416   :  { %v1175_v34 = vmul.f32 %v2795_v32, %v2793_v31 }
 0x418   :  { %v1176_v35 = vpack.c.bf16 %v1175_v34, %v1175_v34 }
 0x41a   :  { %1178 = vst.msk [vmem:[#allocation2 + $0x2] sm:$0x1] %vm701_vm4, %v1176_v35  ;;  %2544 = vmatmul.mubr.msk.bf16.vlgmr.msra.gmra.mxu1 %vm335_vm3, %v1176_v35  ;;  %2545 = vmatmul.mubr.msk.bf16.vlgmr.msra.gmra.mxu0 %vm335_vm3, %v1176_v35 }
 0x41b   :  { %1604 = vmatprep.mubr.bf16.mxu1 %v2926_v24  ;;  %1645 = vmatprep.mubr.bf16.mxu0 %v2926_v24 }
 0x41c   :  { %1581 = vmatpush1.bf16.msra.mxu1 %v2696_v38  ;;  %1622 = vmatpush1.bf16.msra.mxu0 %v2699_v39  ;;  %v1465_v38 = vcombine.low %v1417_v37, %v1418_v36 }
 0x41d   :  { %1582 = vmatprep.subr.bf16.mxu1 %v2704_v40  ;;  %1623 = vmatprep.subr.bf16.mxu0 %v2707_v47 }
 0x420   :  { %1583 = vmatpush1.bf16.msra.mxu1 %v2702_v41  ;;  %1624 = vmatpush1.bf16.msra.mxu0 %v2705_v45  ;;  %v1473_v45 = vrot.slane %v1465_v38, %v3017_v56 }
 0x421   :  { %1584 = vmatprep.subr.bf16.mxu1 %v2710_v49  ;;  %1625 = vmatprep.subr.bf16.mxu0 %v2713_v42  ;;  %v1419_v39 = vld [vmem:[#allocation2 + $0x2] sm:$0x1]  ;;  %v3204_v49 = vld [vmem:[#allocation6 + $0xe0] ss:$16 sps:$4 sm:$0xff]   ;;  %v3206_v42 = vld [vmem:[#allocation6 + $0xe8] ss:$16 sps:$4 sm:$0xff]  }
 0x424   :  { %1585 = vmatpush1.bf16.msra.mxu1 %v2708_v43  ;;  %1626 = vmatpush1.bf16.msra.mxu0 %v2711_v44  ;;  %v3209_v44 = vld [vmem:[#allocation6 + $0xc4] ss:$16 sps:$4 sm:$0xff]  }
 0x425   :  { %1586 = vmatprep.subr.bf16.mxu1 %v2716_v53  ;;  %1627 = vmatprep.subr.bf16.mxu0 %v2719_v54  ;;  %v3211_v53 = vld [vmem:[#allocation6 + $0xcc] ss:$16 sps:$4 sm:$0xff]   ;;  %v3217_v54 = vld [vmem:[#allocation6 + $0xc0] ss:$16 sps:$4 sm:$0xff]  }
 0x428   :  { %1587 = vmatpush1.bf16.msra.mxu1 %v2714_v55  ;;  %1628 = vmatpush1.bf16.msra.mxu0 %v2717_v57  ;;  %v3219_v55 = vld [vmem:[#allocation6 + $0xc8] ss:$16 sps:$4 sm:$0xff]   ;;  %v3225_v57 = vld [vmem:[#allocation6 + $0xac] ss:$16 sps:$4 sm:$0xff]  }
 0x429   :  { %1803 = vmatprep.subr.bf16.mxu1 %v3189_v63  ;;  %1844 = vmatprep.subr.bf16.mxu0 %v3191_v0 }
 0x4da   :  { %v1312_v3 = vpop.f32.mrf.mxu1  ;;  %v1353_v4 = vpop.f32.mrf.mxu0 }
 0x4dc   :  { %v1314_v5 = vpop.f32.mrf.mxu1  ;;  %v1355_v6 = vpop.f32.mrf.mxu0 }
 0x4dd   :  { %v1364_v7 = vcombine.low %v1312_v3, %v1314_v5  ;;  %v1365_v8 = vcombine.low %v1353_v4, %v1355_v6  ;;  %v3231_v3 = vld [vmem:[#allocation6 + $0xa0] ss:$16 sps:$4 sm:$0xff]   ;;  %v3233_v4 = vld [vmem:[#allocation6 + $0xa8] ss:$16 sps:$4 sm:$0xff]   ;;  %v3237_v5 = vld [vmem:[#allocation6 + $0x84] ss:$16 sps:$4 sm:$0xff]  }
 0x4de   :  { %v1316_v9 = vpop.f32.mrf.mxu1  ;;  %v1357_v10 = vpop.f32.mrf.mxu0  ;;  %v3239_v6 = vld [vmem:[#allocation6 + $0x8c] ss:$16 sps:$4 sm:$0xff]  }
 0x4df   :  { %v1372_v52 = vrot.slane %v1364_v7, %v3010_v33  ;;  %v1379_v11 = vrot.slane %v1365_v8, %v3010_v33  ;;  %v3243_v7 = vld [vmem:[#allocation6 + $0x80] ss:$16 sps:$4 sm:$0xff]   ;;  %v3245_v8 = vld [vmem:[#allocation6 + $0x88] ss:$16 sps:$4 sm:$0xff]  }
 0x4e0   :  { %v1317_v58 = vpop.f32.mrf.mxu1  ;;  %v1358_v12 = vpop.f32.mrf.mxu0  ;;  %v2549_v9 = vld [vmem:[%s3392_s5 + $0x4] sm:$0xf] }
 0x4e1   :  { %v1380_v13 = vcombine.low %v1372_v52, %v1379_v11  ;;  %v1444_v10 = vrot.slane %v2549_v9, %v209_v15  ;;  %v1452_v52 = vrot.slane %v2549_v9, %v217_v16  ;;  %v1448_v11 = vrot.slane %v2549_v9, %v213_v17 }
 0x4e2   :  { %v1456_v58 = vrot.slane %v2549_v9, %v221_v18 }
 0x4e3   :  { %v1382_v14 = vadd.f32 %v1380_v13, %v460_v51 }
 0x4e5   :  { %v2546_v59 = vmul.f32 -1.442695, %v1382_v14  ;;  %v1390_v60 = vrot.slane %v1382_v14, 2  ;;  %v1401_v62 = vrot.slane %v1382_v14, 6  ;;  %v1398_v20 = vrot.slane %v1382_v14, 4 }
 0x4e7   :  { %2796 = vpow2.f32 %v2546_v59  ;;  %v2547_v61 = vmul.f32 -1.442695, %v1390_v60  ;;  %v2548_v2 = vmul.f32 -1.442695, %v1401_v62 }
 0x4e9   :  { %2798 = vpow2.f32 %v2547_v61 }
 0x4ea   :  { %2800 = vpow2.f32 %v2548_v2 }
 0x4f4   :  { %v2797_v19 = vpop.eup %2796 }
 0x4f5   :  { %v1386_v21 = vadd.f32 1.0, %v2797_v19 }
 0x4f6   :  { %v2799_v25 = vpop.eup %2798 }
 0x4f7   :  { %2802 = vrcp.f32 %v1386_v21  ;;  %v1395_v26 = vadd.f32 1.0, %v2799_v25  ;;  %v2801_v27 = vpop.eup %2800 }
 0x4f8   :  { %2804 = vtanh.f32 %v1398_v20  ;;  %v1406_v51 = vadd.f32 1.0, %v2801_v27 }
 0x4f9   :  { %2806 = vrcp.f32 %v1395_v26 }
 0x4fa   :  { %2808 = vrcp.f32 %v1406_v51 }
 0x504   :  { %v2803_v50 = vpop.eup %2802 }
 0x505   :  { %v2805_v46 = vpop.eup %2804 }
 0x506   :  { %v2807_v48 = vpop.eup %2806  ;;  %v1410_v22 = vmul.f32 %v2805_v46, %v2803_v50 }
 0x507   :  { %v1409_v28 = vmul.f32 %v2807_v48, %v3181_v30  ;;  %v2809_v31 = vpop.eup %2808 }
 0x509   :  { %v1411_v23 = vadd.f32 %v1410_v22, %v1409_v28 }
 0x50b   :  { %2810 = vtanh.f32 %v1411_v23 }
 0x518   :  { %v2811_v32 = vpop.eup %2810 }
 0x519   :  { %v1413_v34 = vmul.f32 %v2811_v32, %v2809_v31 }
 0x51b   :  { %v1414_v35 = vpack.c.bf16 %v1413_v34, %v1413_v34 }
 0x51d   :  { %1416 = vst.msk [vmem:[#allocation2 + $0x3] sm:$0x1] %vm701_vm4, %v1414_v35 }
 0x524   :  { %v1420_v40 = vld [vmem:[#allocation2 + $0x3] sm:$0x1] }
 0x525   :  { %v1466_v41 = vcombine.low %v1419_v39, %v1420_v40 }
 0x527   :  { %v1480_v30 = vrot.slane %v1466_v41, %v3017_v56 }
 0x529   :  { %v1481_v47 = vcombine.low %v1473_v45, %v1480_v30 }
 0x52b   :  { %v1488_v43 = vrot.slane %v1481_v47, %v3017_v56  ;;  %v3223_v56 = vld [vmem:[#allocation6 + $0xa4] ss:$16 sps:$4 sm:$0xff]  }
 0x52d   :  { %2566 = vmatmul.mubr.msk.bf16.vlgmr.msra.gmra.mxu1 %vm335_vm3, %v1488_v43  ;;  %2567 = vmatmul.mubr.msk.bf16.vlgmr.msra.gmra.mxu0 %vm335_vm3, %v1488_v43 }
 0x52e   :  { %1804 = vmatpush1.bf16.msra.mxu1 %v3204_v49  ;;  %1845 = vmatpush1.bf16.msra.mxu0 %v3206_v42 }
 0x52f   :  { %1805 = vmatprep.subr.bf16.mxu1 %v3209_v44  ;;  %1846 = vmatprep.subr.bf16.mxu0 %v3211_v53 }
 0x530   :  { %1827 = vmatprep.mubr.bf16.mxu1 %v2926_v24  ;;  %1868 = vmatprep.mubr.bf16.mxu0 %v2926_v24 }
 0x532   :  { %1806 = vmatpush1.bf16.msra.mxu1 %v3217_v54  ;;  %1847 = vmatpush1.bf16.msra.mxu0 %v3219_v55 }
 0x533   :  { %1807 = vmatprep.subr.bf16.mxu1 %v3223_v56  ;;  %1848 = vmatprep.subr.bf16.mxu0 %v3225_v57 }
 0x536   :  { %1808 = vmatpush1.bf16.msra.mxu1 %v3231_v3  ;;  %1849 = vmatpush1.bf16.msra.mxu0 %v3233_v4 }
 0x537   :  { %1809 = vmatprep.subr.bf16.mxu1 %v3237_v5  ;;  %1850 = vmatprep.subr.bf16.mxu0 %v3239_v6 }
 0x53a   :  { %1810 = vmatpush1.bf16.msra.mxu1 %v3243_v7  ;;  %1851 = vmatpush1.bf16.msra.mxu0 %v3245_v8 }
 0x53b   :  { %1943 = vmatprep.subr.bf16.mxu1 %v3189_v63  ;;  %1984 = vmatprep.subr.bf16.mxu0 %v3191_v0 }
 0x53d   :  { %1828 = vmatmul.mubr.bf16.vlgmr.msra.gmra.mxu1 %v2926_v24  ;;  %1869 = vmatmul.mubr.bf16.vlgmr.msra.gmra.mxu0 %v2926_v24 }
 0x53e   :  { %1944 = vmatpush1.bf16.msra.mxu1 %v3204_v49  ;;  %1985 = vmatpush1.bf16.msra.mxu0 %v3206_v42 }
 0x53f   :  { %1945 = vmatprep.subr.bf16.mxu1 %v3209_v44  ;;  %1986 = vmatprep.subr.bf16.mxu0 %v3211_v53 }
 0x540   :  { %1967 = vmatprep.mubr.bf16.mxu1 %v2926_v24  ;;  %2008 = vmatprep.mubr.bf16.mxu0 %v2926_v24 }
 0x542   :  { %1946 = vmatpush1.bf16.msra.mxu1 %v3217_v54  ;;  %1987 = vmatpush1.bf16.msra.mxu0 %v3219_v55 }
 0x543   :  { %1947 = vmatprep.subr.bf16.mxu1 %v3223_v56  ;;  %1988 = vmatprep.subr.bf16.mxu0 %v3225_v57 }
 0x546   :  { %1948 = vmatpush1.bf16.msra.mxu1 %v3231_v3  ;;  %1989 = vmatpush1.bf16.msra.mxu0 %v3233_v4 }
 0x547   :  { %1949 = vmatprep.subr.bf16.mxu1 %v3237_v5  ;;  %1990 = vmatprep.subr.bf16.mxu0 %v3239_v6 }
 0x54a   :  { %1950 = vmatpush1.bf16.msra.mxu1 %v3243_v7  ;;  %1991 = vmatpush1.bf16.msra.mxu0 %v3245_v8 }
 0x54b   :  { %2083 = vmatprep.subr.bf16.mxu1 %v3189_v63  ;;  %2124 = vmatprep.subr.bf16.mxu0 %v3191_v0 }
 0x5ed   :  { %v1606_v12 = vpop.f32.mrf.mxu1  ;;  %v1647_v13 = vpop.f32.mrf.mxu0 }
 0x5ee   :  { %v1607_v60 = vadd.f32 %v1606_v12, %v1444_v10  ;;  %v1648_v61 = vadd.f32 %v1647_v13, %v1452_v52 }
 0x5ef   :  { %v1608_v14 = vpop.f32.mrf.mxu1  ;;  %v1649_v59 = vpop.f32.mrf.mxu0 }
 0x5f0   :  { %v1609_v62 = vadd.f32 %v1608_v14, %v1448_v11  ;;  %v1650_v2 = vadd.f32 %v1649_v59, %v1456_v58 }
 0x5f1   :  { %v1610_v19 = vpop.f32.mrf.mxu1  ;;  %v1651_v20 = vpop.f32.mrf.mxu0 }
 0x5f2   :  { %v1658_v15 = vcombine.low %v1607_v60, %v1609_v62  ;;  %v1659_v21 = vcombine.high %v1607_v60, %v1609_v62  ;;  %v1660_v25 = vcombine.low %v1648_v61, %v1650_v2  ;;  %v1661_v16 = vcombine.high %v1648_v61, %v1650_v2 }
 0x5f3   :  { %v1611_v26 = vpop.f32.mrf.mxu1  ;;  %v1652_v27 = vpop.f32.mrf.mxu0 }
 0x5f4   :  { %v3285_v17 = vrot.slane %v1658_v15, %v3010_v33  ;;  %v3288_v29 = vrot.slane %v1659_v21, %v3010_v33  ;;  %v3291_v18 = vrot.slane %v1660_v25, %v3010_v33  ;;  %v3294_v50 = vrot.slane %v1661_v16, %v3010_v33 }
 0x5f6   :  { %v1691_v46 = vcombine.high %v3285_v17, %v3291_v18  ;;  %v1692_v48 = vcombine.low %v3288_v29, %v3294_v50  ;;  %v1693_v51 = vcombine.high %v3288_v29, %v3294_v50  ;;  %v1690_v41 = vcombine.low %v3285_v17, %v3291_v18 }
 0x5fd   :  { %v1829_v28 = vpop.f32.mrf.mxu1  ;;  %v1870_v22 = vpop.f32.mrf.mxu0 }
 0x5ff   :  { %v1831_v23 = vpop.f32.mrf.mxu1  ;;  %v1872_v31 = vpop.f32.mrf.mxu0 }
 0x600   :  { %v1881_v32 = vcombine.low %v1829_v28, %v1831_v23  ;;  %v1882_v34 = vcombine.low %v1870_v22, %v1872_v31 }
 0x601   :  { %v1833_v35 = vpop.f32.mrf.mxu1  ;;  %v1874_v36 = vpop.f32.mrf.mxu0 }
 0x602   :  { %v1889_v37 = vrot.slane %v1881_v32, %v3010_v33  ;;  %v1896_v38 = vrot.slane %v1882_v34, %v3010_v33 }
 0x603   :  { %v1834_v39 = vpop.f32.mrf.mxu1  ;;  %v1875_v40 = vpop.f32.mrf.mxu0 }
 0x604   :  { %v1897_v45 = vcombine.low %v1889_v37, %v1896_v38 }
 0x606   :  { %v1899_v30 = vadd.f32 %v1897_v45, %v1690_v41 }
 0x608   :  { %v2584_v47 = vmul.f32 -1.442695, %v1899_v30  ;;  %v1907_v43 = vrot.slane %v1899_v30, 2  ;;  %v1918_v10 = vrot.slane %v1899_v30, 6  ;;  %v1915_v58 = vrot.slane %v1899_v30, 4 }
 0x60a   :  { %2812 = vpow2.f32 %v2584_v47  ;;  %v2585_v9 = vmul.f32 -1.442695, %v1907_v43  ;;  %v2586_v52 = vmul.f32 -1.442695, %v1918_v10 }
 0x60c   :  { %2814 = vpow2.f32 %v2585_v9 }
 0x60d   :  { %2816 = vpow2.f32 %v2586_v52 }
 0x617   :  { %v2813_v11 = vpop.eup %2812 }
 0x618   :  { %v1903_v12 = vadd.f32 1.0, %v2813_v11 }
 0x619   :  { %v2815_v13 = vpop.eup %2814 }
 0x61a   :  { %2818 = vrcp.f32 %v1903_v12  ;;  %v1912_v14 = vadd.f32 1.0, %v2815_v13  ;;  %v2817_v59 = vpop.eup %2816 }
 0x61b   :  { %2820 = vtanh.f32 %v1915_v58  ;;  %v1923_v2 = vadd.f32 1.0, %v2817_v59 }
 0x61c   :  { %2822 = vrcp.f32 %v1912_v14 }
 0x61d   :  { %2824 = vrcp.f32 %v1923_v2 }
 0x627   :  { %v2819_v60 = vpop.eup %2818 }
 0x628   :  { %v2821_v61 = vpop.eup %2820 }
 0x629   :  { %v2823_v62 = vpop.eup %2822  ;;  %v1927_v20 = vmul.f32 %v2821_v61, %v2819_v60 }
 0x62a   :  { %v1926_v19 = vmul.f32 0.0, %v2823_v62  ;;  %v2825_v21 = vpop.eup %2824 }
 0x62c   :  { %v3306_v15 = vadd.f32 %v1927_v20, %v1926_v19 }
 0x62e   :  { %2826 = vtanh.f32 %v3306_v15 }
 0x63b   :  { %v2827_v25 = vpop.eup %2826 }
 0x63c   :  { %v1930_v16 = vmul.f32 %v2827_v25, %v2825_v21 }
 0x63e   :  { %v1931_v26 = vpack.c.bf16 %v1930_v16, %v1930_v16 }
 0x640   :  { %2587 = vmatmul.mubr.msk.bf16.vlgmr.msra.gmra.mxu1 %vm335_vm3, %v1931_v26  ;;  %2588 = vmatmul.mubr.msk.bf16.vlgmr.msra.gmra.mxu0 %vm335_vm3, %v1931_v26 }
 0x641   :  { %2084 = vmatpush1.bf16.msra.mxu1 %v3204_v49  ;;  %2125 = vmatpush1.bf16.msra.mxu0 %v3206_v42 }
 0x642   :  { %2085 = vmatprep.subr.bf16.mxu1 %v3209_v44  ;;  %2126 = vmatprep.subr.bf16.mxu0 %v3211_v53 }
 0x643   :  { %2107 = vmatprep.mubr.bf16.mxu1 %v2926_v24  ;;  %2148 = vmatprep.mubr.bf16.mxu0 %v2926_v24 }
 0x645   :  { %2086 = vmatpush1.bf16.msra.mxu1 %v3217_v54  ;;  %2127 = vmatpush1.bf16.msra.mxu0 %v3219_v55 }
 0x646   :  { %2087 = vmatprep.subr.bf16.mxu1 %v3223_v56  ;;  %2128 = vmatprep.subr.bf16.mxu0 %v3225_v57 }
 0x649   :  { %2088 = vmatpush1.bf16.msra.mxu1 %v3231_v3  ;;  %2129 = vmatpush1.bf16.msra.mxu0 %v3233_v4 }
 0x64a   :  { %2089 = vmatprep.subr.bf16.mxu1 %v3237_v5  ;;  %2130 = vmatprep.subr.bf16.mxu0 %v3239_v6 }
 0x64d   :  { %2090 = vmatpush1.bf16.msra.mxu1 %v3243_v7  ;;  %2131 = vmatpush1.bf16.msra.mxu0 %v3245_v8 }
 0x64e   :  { %2223 = vmatprep.subr.bf16.mxu1 %v3189_v63  ;;  %2264 = vmatprep.subr.bf16.mxu0 %v3191_v0 }
 0x700   :  { %v1969_v27 = vpop.f32.mrf.mxu1  ;;  %v2010_v28 = vpop.f32.mrf.mxu0 }
 0x702   :  { %v1971_v22 = vpop.f32.mrf.mxu1  ;;  %v2012_v23 = vpop.f32.mrf.mxu0 }
 0x703   :  { %v2021_v31 = vcombine.low %v1969_v27, %v1971_v22  ;;  %v2022_v32 = vcombine.low %v2010_v28, %v2012_v23 }
 0x704   :  { %v1973_v34 = vpop.f32.mrf.mxu1  ;;  %v2014_v35 = vpop.f32.mrf.mxu0 }
 0x705   :  { %v2029_v36 = vrot.slane %v2021_v31, %v3010_v33  ;;  %v2036_v37 = vrot.slane %v2022_v32, %v3010_v33 }
 0x706   :  { %v1974_v38 = vpop.f32.mrf.mxu1  ;;  %v2015_v39 = vpop.f32.mrf.mxu0 }
 0x707   :  { %v2037_v40 = vcombine.low %v2029_v36, %v2036_v37 }
 0x709   :  { %v2039_v63 = vadd.f32 %v2037_v40, %v1691_v46 }
 0x70b   :  { %v2589_v0 = vmul.f32 -1.442695, %v2039_v63  ;;  %v2047_v41 = vrot.slane %v2039_v63, 2  ;;  %v2058_v30 = vrot.slane %v2039_v63, 6  ;;  %v2055_v9 = vrot.slane %v2039_v63, 4  ;;  %v2744_v63 = vld [vmem:[%s3393_s6 + $0x18] sm:$0xff]  }
 0x70d   :  { %2828 = vpow2.f32 %v2589_v0  ;;  %v2590_v45 = vmul.f32 -1.442695, %v2047_v41  ;;  %v2591_v47 = vmul.f32 -1.442695, %v2058_v30  ;;  %v2745_v0 = vld [vmem:[%s3393_s6 + $0x10] sm:$0xff]   ;;  %v2746_v41 = vld [vmem:[%s3393_s6 + $0x8] sm:$0xff]  }
 0x70f   :  { %2830 = vpow2.f32 %v2590_v45  ;;  %v2747_v45 = vld [vmem:[%s3393_s6] sm:$0xff]  }
 0x710   :  { %2832 = vpow2.f32 %v2591_v47 }
 0x71a   :  { %v2829_v43 = vpop.eup %2828 }
 0x71b   :  { %v2043_v10 = vadd.f32 1.0, %v2829_v43 }
 0x71c   :  { %v2831_v52 = vpop.eup %2830 }
 0x71d   :  { %2834 = vrcp.f32 %v2043_v10  ;;  %v2052_v11 = vadd.f32 1.0, %v2831_v52  ;;  %v2833_v58 = vpop.eup %2832 }
 0x71e   :  { %2836 = vtanh.f32 %v2055_v9  ;;  %v2063_v46 = vadd.f32 1.0, %v2833_v58 }
 0x71f   :  { %2838 = vrcp.f32 %v2052_v11 }
 0x720   :  { %2840 = vrcp.f32 %v2063_v46 }
 0x72a   :  { %v2835_v12 = vpop.eup %2834 }
 0x72b   :  { %v2837_v17 = vpop.eup %2836 }
 0x72c   :  { %v2839_v18 = vpop.eup %2838  ;;  %v2067_v13 = vmul.f32 %v2837_v17, %v2835_v12 }
 0x72d   :  { %v2066_v14 = vmul.f32 %v2839_v18, %v3306_v15  ;;  %v2841_v60 = vpop.eup %2840 }
 0x72f   :  { %v2068_v59 = vadd.f32 %v2067_v13, %v2066_v14 }
 0x731   :  { %2842 = vtanh.f32 %v2068_v59 }
 0x73e   :  { %v2843_v61 = vpop.eup %2842 }
 0x73f   :  { %v2070_v62 = vmul.f32 %v2843_v61, %v2841_v60 }
 0x741   :  { %v2071_v2 = vpack.c.bf16 %v2070_v62, %v2070_v62 }
 0x743   :  { %2592 = vmatmul.mubr.msk.bf16.vlgmr.msra.gmra.mxu1 %vm335_vm3, %v2071_v2  ;;  %2593 = vmatmul.mubr.msk.bf16.vlgmr.msra.gmra.mxu0 %vm335_vm3, %v2071_v2 }
 0x744   :  { %2224 = vmatpush1.bf16.msra.mxu1 %v3204_v49  ;;  %2265 = vmatpush1.bf16.msra.mxu0 %v3206_v42 }
 0x745   :  { %2225 = vmatprep.subr.bf16.mxu1 %v3209_v44  ;;  %2266 = vmatprep.subr.bf16.mxu0 %v3211_v53 }
 0x746   :  { %2247 = vmatprep.mubr.bf16.mxu1 %v2926_v24  ;;  %2288 = vmatprep.mubr.bf16.mxu0 %v2926_v24 }
 0x748   :  { %2226 = vmatpush1.bf16.msra.mxu1 %v3217_v54  ;;  %2267 = vmatpush1.bf16.msra.mxu0 %v3219_v55 }
 0x749   :  { %2227 = vmatprep.subr.bf16.mxu1 %v3223_v56  ;;  %2268 = vmatprep.subr.bf16.mxu0 %v3225_v57 }
 0x74c   :  { %2228 = vmatpush1.bf16.msra.mxu1 %v3231_v3  ;;  %2269 = vmatpush1.bf16.msra.mxu0 %v3233_v4 }
 0x74d   :  { %2229 = vmatprep.subr.bf16.mxu1 %v3237_v5  ;;  %2270 = vmatprep.subr.bf16.mxu0 %v3239_v6 }
 0x750   :  { %2230 = vmatpush1.bf16.msra.mxu1 %v3243_v7  ;;  %2271 = vmatpush1.bf16.msra.mxu0 %v3245_v8 }
 0x751   :  { %2624 = vmatprep.subr.bf16.mxu1 %v2924_v1 }
 0x803   :  { %v2109_v24 = vpop.f32.mrf.mxu1  ;;  %v2150_v49 = vpop.f32.mrf.mxu0 }
 0x805   :  { %v2111_v42 = vpop.f32.mrf.mxu1  ;;  %v2152_v44 = vpop.f32.mrf.mxu0 }
 0x806   :  { %v2161_v53 = vcombine.low %v2109_v24, %v2111_v42  ;;  %v2162_v54 = vcombine.low %v2150_v49, %v2152_v44 }
 0x807   :  { %v2113_v55 = vpop.f32.mrf.mxu1  ;;  %v2154_v56 = vpop.f32.mrf.mxu0 }
 0x808   :  { %v2169_v57 = vrot.slane %v2161_v53, %v3010_v33  ;;  %v2176_v3 = vrot.slane %v2162_v54, %v3010_v33 }
 0x809   :  { %v2114_v4 = vpop.f32.mrf.mxu1  ;;  %v2155_v5 = vpop.f32.mrf.mxu0 }
 0x80a   :  { %v2177_v6 = vcombine.low %v2169_v57, %v2176_v3 }
 0x80c   :  { %v2179_v7 = vadd.f32 %v2177_v6, %v1692_v48  ;;  %v2602_v6 = vld [vmem:[#allocation3] ss:$0 sm:$0xff] }
 0x80e   :  { %v2594_v8 = vmul.f32 -1.442695, %v2179_v7  ;;  %v2187_v19 = vrot.slane %v2179_v7, 2  ;;  %v2198_v15 = vrot.slane %v2179_v7, 6  ;;  %v2195_v16 = vrot.slane %v2179_v7, 4 }
 0x810   :  { %2844 = vpow2.f32 %v2594_v8  ;;  %v2595_v20 = vmul.f32 -1.442695, %v2187_v19  ;;  %v2596_v21 = vmul.f32 -1.442695, %v2198_v15 }
 0x812   :  { %2846 = vpow2.f32 %v2595_v20 }
 0x813   :  { %2848 = vpow2.f32 %v2596_v21 }
 0x81d   :  { %v2845_v25 = vpop.eup %2844 }
 0x81e   :  { %v2183_v26 = vadd.f32 1.0, %v2845_v25 }
 0x81f   :  { %v2847_v27 = vpop.eup %2846 }
 0x820   :  { %2850 = vrcp.f32 %v2183_v26  ;;  %v2192_v28 = vadd.f32 1.0, %v2847_v27  ;;  %v2849_v22 = vpop.eup %2848 }
 0x821   :  { %2852 = vtanh.f32 %v2195_v16  ;;  %v2203_v32 = vadd.f32 1.0, %v2849_v22 }
 0x822   :  { %2854 = vrcp.f32 %v2192_v28 }
 0x823   :  { %2856 = vrcp.f32 %v2203_v32 }
 0x82d   :  { %v2851_v23 = vpop.eup %2850 }
 0x82e   :  { %v2853_v31 = vpop.eup %2852 }
 0x82f   :  { %v2855_v48 = vpop.eup %2854  ;;  %v2207_v34 = vmul.f32 %v2853_v31, %v2851_v23 }
 0x830   :  { %v2206_v35 = vmul.f32 %v2855_v48, %v2068_v59  ;;  %v2857_v37 = vpop.eup %2856 }
 0x832   :  { %v2208_v36 = vadd.f32 %v2207_v34, %v2206_v35 }
 0x834   :  { %2858 = vtanh.f32 %v2208_v36 }
 0x841   :  { %v2859_v38 = vpop.eup %2858 }
 0x842   :  { %v2210_v39 = vmul.f32 %v2859_v38, %v2857_v37 }
 0x844   :  { %v2211_v40 = vpack.c.bf16 %v2210_v39, %v2210_v39 }
 0x846   :  { %2597 = vmatmul.mubr.msk.bf16.vlgmr.msra.gmra.mxu1 %vm335_vm3, %v2211_v40  ;;  %2598 = vmatmul.mubr.msk.bf16.vlgmr.msra.gmra.mxu0 %vm335_vm3, %v2211_v40 }
 0x847   :  { %2632 = vmatprep.mubr.msk.bf16.mxu1 %vm2925_vm0, %v2924_v1  ;;  %2625 = vmatpush3.bf16.msra.mxu1 %v2744_v63 }
 0x848   :  { %2626 = vmatprep.subr.bf16.mxu1 %v2924_v1 }
 0x84b   :  { %2627 = vmatpush3.bf16.msra.mxu1 %v2745_v0 }
 0x84c   :  { %2628 = vmatprep.subr.bf16.mxu1 %v2924_v1 }
 0x84f   :  { %2629 = vmatpush3.bf16.msra.mxu1 %v2746_v41 }
 0x850   :  { %2630 = vmatprep.subr.bf16.mxu1 %v2924_v1 }
 0x853   :  { %2631 = vmatpush3.bf16.msra.mxu1 %v2747_v45 }
 0x906   :  { %v2249_v30 = vpop.f32.mrf.mxu1  ;;  %v2290_v47 = vpop.f32.mrf.mxu0 }
 0x908   :  { %v2251_v43 = vpop.f32.mrf.mxu1  ;;  %v2292_v9 = vpop.f32.mrf.mxu0 }
 0x909   :  { %v2301_v10 = vcombine.low %v2249_v30, %v2251_v43  ;;  %v2302_v52 = vcombine.low %v2290_v47, %v2292_v9 }
 0x90a   :  { %v2253_v11 = vpop.f32.mrf.mxu1  ;;  %v2294_v58 = vpop.f32.mrf.mxu0 }
 0x90b   :  { %v2309_v12 = vrot.slane %v2301_v10, %v3010_v33  ;;  %v2316_v17 = vrot.slane %v2302_v52, %v3010_v33 }
 0x90c   :  { %v2254_v18 = vpop.f32.mrf.mxu1  ;;  %v2295_v46 = vpop.f32.mrf.mxu0 }
 0x90d   :  { %v2317_v13 = vcombine.low %v2309_v12, %v2316_v17 }
 0x90f   :  { %v2319_v1 = vadd.f32 %v2317_v13, %v1693_v51 }
 0x911   :  { %v2599_v14 = vmul.f32 -1.442695, %v2319_v1  ;;  %v2327_v59 = vrot.slane %v2319_v1, 2  ;;  %v2338_v61 = vrot.slane %v2319_v1, 6  ;;  %v2335_v24 = vrot.slane %v2319_v1, 4 }
 0x913   :  { %2860 = vpow2.f32 %v2599_v14  ;;  %v2600_v60 = vmul.f32 -1.442695, %v2327_v59  ;;  %v2601_v62 = vmul.f32 -1.442695, %v2338_v61 }
 0x915   :  { %2862 = vpow2.f32 %v2600_v60 }
 0x916   :  { %2864 = vpow2.f32 %v2601_v62 }
 0x920   :  { %v2861_v2 = vpop.eup %2860 }
 0x921   :  { %v2323_v49 = vadd.f32 1.0, %v2861_v2 }
 0x922   :  { %v2863_v42 = vpop.eup %2862 }
 0x923   :  { %2866 = vrcp.f32 %v2323_v49  ;;  %v2332_v33 = vadd.f32 1.0, %v2863_v42  ;;  %v2865_v44 = vpop.eup %2864 }
 0x924   :  { %2868 = vtanh.f32 %v2335_v24  ;;  %v2343_v51 = vadd.f32 1.0, %v2865_v44 }
 0x925   :  { %2870 = vrcp.f32 %v2332_v33 }
 0x926   :  { %2872 = vrcp.f32 %v2343_v51 }
 0x930   :  { %v2867_v53 = vpop.eup %2866 }
 0x931   :  { %v2869_v29 = vpop.eup %2868 }
 0x932   :  { %v2871_v50 = vpop.eup %2870  ;;  %v2347_v55 = vmul.f32 %v2869_v29, %v2867_v53 }
 0x933   :  { %v2346_v54 = vmul.f32 %v2871_v50, %v2208_v36  ;;  %v2873_v57 = vpop.eup %2872 }
 0x935   :  { %v2348_v56 = vadd.f32 %v2347_v55, %v2346_v54 }
 0x937   :  { %2874 = vtanh.f32 %v2348_v56 }
 0x944   :  { %v2875_v3 = vpop.eup %2874 }
 0x945   :  { %v2350_v4 = vmul.f32 %v2875_v3, %v2873_v57 }
 0x947   :  { %v2351_v5 = vpack.c.bf16 %v2350_v4, %v2350_v4 }
 0x949   :  { %2633 = vmatmul.mubr.msk.bf16.vlgmr.msra.gmra.mxu1 %vm335_vm3, %v2351_v5 }
 0xa09   :  { %v2428_v7 = vpop.f32.mrf.mxu1 }
 0xa0a   :  { %v2429_v8 = vadd.f32 %v2602_v6, %v2428_v7 }
 0xa0b   :  { %v2634_v19 = vpop.f32.mrf.mxu1 }
 0xa0c   :  { %2435 = vst.msk [vmem:[%s3395_s8] sm:$0x3] %vm2434_vm5, %v2429_v8 }
 0xa0d   :  { %v2431_v20 = vpop.f32.mrf.mxu1 }
 0xa0f   :  { %v2635_v15 = vpop.f32.mrf.mxu1 }
 0xa10   :  { %2440 = vsyncpa [#allocation5], 1 }
 0xa11   :  { %2441 = vsyncpa [#allocation7], 1 }

</bundles_post_ra>
